<compile_context>
chip_gen: v5e
topology: v5e:2x2
jax: 0.10.0
libtpu: 0.0.40
codegen_flags: <defaults>
</compile_context>

<pallas_src>
import functools

import jax
import jax.numpy as jnp
from jax.experimental import pallas as pl
from jax.experimental.pallas import tpu as pltpu


def _cdiv(a, b):
    return (a + b - 1) // b


def _round_up(a, b):
    return _cdiv(a, b) * b


def _conv_softsign_kernel(x_ref, w_ref, b_ref, o_ref, *, f, wp):
    # x_ref: (Hp_pad*Wp, C_in)   -- flattened padded image, resident per batch
    # w_ref: (f*f, C_in, C_out)  -- resident
    # b_ref: (1, C_out)
    # o_ref: (TH*Wp, C_out)      -- this row-tile of the (padded-grid) output
    th_wp = o_ref.shape[0]
    # Element offset of this row tile inside the resident image (stride-1 grid).
    base = pl.multiple_of(pl.program_id(1) * th_wp, 8)

    acc = jnp.zeros(o_ref.shape, jnp.float32)
    # Fused im2col: f*f contiguous shifted slabs of the flattened image, each
    # feeding a (TH*Wp, C_in) x (C_in, C_out) MXU matmul accumulated in f32.
    for kh in range(f):
        for kw in range(f):
            slab = x_ref[pl.ds(base + kh * wp + kw, th_wp), :]
            acc = acc + jnp.dot(slab, w_ref[kh * f + kw],
                                preferred_element_type=jnp.float32)

    acc = acc + b_ref[...].astype(jnp.float32)              # broadcast (1, C_out)
    y = acc * pl.reciprocal(1.0 + jnp.abs(acc), approx=False)  # Softsign
    o_ref[...] = y.astype(o_ref.dtype)


@functools.partial(jax.jit, static_argnames=("stride", "padding"))
def conv_act(x: jax.Array, weight: jax.Array, bias: jax.Array,
             *, stride: int, padding: int) -> jax.Array:
    """ConvAct forward: Softsign(Conv2d(x)).  x: NCHW, weight: OIHW, bias: (C_out,)."""
    n, c_in, h, w = x.shape
    c_out, _, f, _ = weight.shape
    s, p = stride, padding

    hp, wp = h + 2 * p, w + 2 * p
    h1, w1 = hp - f + 1, wp - f + 1          # stride-1 output extents

    # ---- row-tile heuristic: big tiles (~1024 rows), but keep >= ~4 grid steps
    target_rows = 1024
    th = (target_rows // wp) // 8 * 8
    if th == 0:
        th = 8
    th = max(8, min(th, _round_up(h1, 8)))   # multiple of 8 (sublane granularity)
    while th > 8 and n * _cdiv(h1, th) < 4:
        th = max(8, (th // 2) // 8 * 8)
    num_rt = _cdiv(h1, th)
    h1_pad = num_rt * th
    hp_pad = h1_pad + f                       # extra zero rows: tile pad + kw overhang

    # ---- layout-only prep in the wrapper (cheap, read/written once) ----------
    x_nhwc = jnp.transpose(x, (0, 2, 3, 1))                              # (N,H,W,Cin)
    x_pad = jnp.pad(x_nhwc, ((0, 0), (p, hp_pad - h - p), (p, p), (0, 0)))
    x_flat = x_pad.reshape(n, hp_pad * wp, c_in)                         # (N, L, Cin)

    # (C_out, C_in, kh, kw) -> (kh, kw, C_in, C_out) -> (f*f, C_in, C_out)
    w_mat = jnp.transpose(weight, (2, 3, 1, 0)).reshape(f * f, c_in, c_out)
    b_mat = bias.reshape(1, c_out)

    th_wp = th * wp
    kernel = functools.partial(_conv_softsign_kernel, f=f, wp=wp)

    itemsize = jnp.dtype(x.dtype).itemsize
    flops = 2 * n * h1_pad * wp * c_in * c_out * f * f
    bytes_accessed = (x_flat.size + w_mat.size + b_mat.size
                      + n * h1_pad * wp * c_out) * itemsize

    out_flat = pl.pallas_call(
        kernel,
        out_shape=jax.ShapeDtypeStruct((n, h1_pad * wp, c_out), x.dtype),
        grid=(n, num_rt),
        in_specs=[
            # Whole flattened padded image resident per batch element (read from
            # HBM once per batch per core; index map ignores the row-tile axis).
            pl.BlockSpec((None, hp_pad * wp, c_in), lambda b, r: (b, 0, 0)),
            pl.BlockSpec((f * f, c_in, c_out), lambda b, r: (0, 0, 0)),  # weights resident
            pl.BlockSpec((1, c_out), lambda b, r: (0, 0)),               # bias resident
        ],
        out_specs=pl.BlockSpec((None, th_wp, c_out), lambda b, r: (b, r, 0)),
        compiler_params=pltpu.CompilerParams(
            dimension_semantics=("parallel", "parallel")),
        cost_estimate=pl.CostEstimate(
            flops=flops,
            transcendentals=n * h1_pad * wp * c_out,
            bytes_accessed=bytes_accessed),
    )(x_flat, w_mat, b_mat)

    # Drop padded/junk rows+columns of the padded grid; subsample for stride>1.
    out = out_flat.reshape(n, h1_pad, wp, c_out)[:, :h1:s, :w1:s, :]     # (N,Ho,Wo,Cout)
    return jnp.transpose(out, (0, 3, 1, 2))                              # NCHW


if __name__ == "__main__":
    key = jax.random.PRNGKey(0)
    kx, kw, kb = jax.random.split(key, 3)

    # Small shapes consistent with the module: batch=2, in_ch=4, out_ch=8,
    # 3x3 kernel, stride=1, padding=1, 16x16 spatial.
    N, C_IN, C_OUT, F, S, P, H, W = 2, 4, 8, 3, 1, 1, 16, 16

    x = jax.random.normal(kx, (N, C_IN, H, W), dtype=jnp.float32)
    w = jax.random.normal(kw, (C_OUT, C_IN, F, F), dtype=jnp.float32) * 0.1
    b = jax.random.normal(kb, (C_OUT,), dtype=jnp.float32) * 0.1

    y = conv_act(x, w, b, stride=S, padding=P)
    y = jax.block_until_ready(y)

    # Reference: XLA conv + softsign, same semantics as nn.Conv2d + nn.Softsign.
    conv_ref = jax.lax.conv_general_dilated(
        x, w, window_strides=(S, S), padding=((P, P), (P, P)),
        dimension_numbers=("NCHW", "OIHW", "NCHW"))
    z_ref = conv_ref + b.reshape(1, -1, 1, 1)
    y_ref = z_ref / (1.0 + jnp.abs(z_ref))

    assert y.shape == y_ref.shape and y.dtype == y_ref.dtype
    assert jnp.allclose(y, y_ref, atol=1e-5, rtol=1e-5), "mismatch vs reference ConvAct"

    print("KERNEL_OK")
</pallas_src>

<mosaic_0001>
module attributes {stable_mosaic.version = 11 : i64} {
  func.func @_conv_softsign_kernel(%arg0: i32, %arg1: i32, %arg2: memref<1x342x4xf32, #tpu.memory_space<vmem>>, %arg3: memref<9x4x8xf32, #tpu.memory_space<vmem>>, %arg4: memref<1x8xf32, #tpu.memory_space<vmem>>, %arg5: memref<1x144x8xf32, #tpu.memory_space<vmem>>) attributes {dimension_semantics = [#tpu.dimension_semantics<parallel>, #tpu.dimension_semantics<parallel>], iteration_bounds = array<i64: 2, 2>, scalar_prefetch = 0 : i64, scratch_operands = 0 : i64, tpu.core_type = #tpu.core_type<tc>, window_params = [{transform_indices = @transform_0, window_bounds = array<i64: 1, 342, 4>}, {pipeline_mode = #tpu.pipeline_mode<synchronous>, transform_indices = @transform_1, window_bounds = array<i64: 9, 4, 8>}, {pipeline_mode = #tpu.pipeline_mode<synchronous>, transform_indices = @transform_2, window_bounds = array<i64: 1, 8>}, {transform_indices = @transform_3, window_bounds = array<i64: 1, 144, 8>}]} {
    %c144_i32 = arith.constant 144 : i32
    %0 = arith.muli %arg1, %c144_i32 : i32
    %1 = tpu.assume_multiple %0, 8 : i32
    %cst = arith.constant 0.000000e+00 : f32
    %2 = vector.broadcast %cst : f32 to vector<144x8xf32>
    %c0_i32 = arith.constant 0 : i32
    %3 = arith.addi %1, %c0_i32 : i32
    %c0_i32_0 = arith.constant 0 : i32
    %4 = arith.addi %3, %c0_i32_0 : i32
    %c0 = arith.constant 0 : index
    %5 = arith.index_cast %4 : i32 to index
    %c0_1 = arith.constant 0 : index
    %6 = vector.load %arg2[%c0, %5, %c0_1] : memref<1x342x4xf32, #tpu.memory_space<vmem>>, vector<1x144x4xf32>
    %7 = vector.shape_cast %6 : vector<1x144x4xf32> to vector<144x4xf32>
    %c0_2 = arith.constant 0 : index
    %c0_3 = arith.constant 0 : index
    %c0_4 = arith.constant 0 : index
    %8 = vector.load %arg3[%c0_2, %c0_3, %c0_4] : memref<9x4x8xf32, #tpu.memory_space<vmem>>, vector<1x4x8xf32>
    %9 = vector.shape_cast %8 : vector<1x4x8xf32> to vector<4x8xf32>
    %cst_5 = arith.constant dense<0.000000e+00> : vector<144x8xf32>
    %10 = tpu.matmul %7, %9, %cst_5 {dimension_numbers = #tpu.dot_dimension_numbers<[1], [0], [0], [1], [0, 0, 1, 1], [], []>} : vector<144x4xf32>, vector<4x8xf32>, vector<144x8xf32> -> vector<144x8xf32>
    %11 = arith.addf %2, %10 : vector<144x8xf32>
    %c0_i32_6 = arith.constant 0 : i32
    %12 = arith.addi %1, %c0_i32_6 : i32
    %c1_i32 = arith.constant 1 : i32
    %13 = arith.addi %12, %c1_i32 : i32
    %c0_7 = arith.constant 0 : index
    %14 = arith.index_cast %13 : i32 to index
    %c0_8 = arith.constant 0 : index
    %15 = vector.load %arg2[%c0_7, %14, %c0_8] : memref<1x342x4xf32, #tpu.memory_space<vmem>>, vector<1x144x4xf32>
    %16 = vector.shape_cast %15 : vector<1x144x4xf32> to vector<144x4xf32>
    %c1 = arith.constant 1 : index
    %c0_9 = arith.constant 0 : index
    %c0_10 = arith.constant 0 : index
    %17 = vector.load %arg3[%c1, %c0_9, %c0_10] : memref<9x4x8xf32, #tpu.memory_space<vmem>>, vector<1x4x8xf32>
    %18 = vector.shape_cast %17 : vector<1x4x8xf32> to vector<4x8xf32>
    %cst_11 = arith.constant dense<0.000000e+00> : vector<144x8xf32>
    %19 = tpu.matmul %16, %18, %cst_11 {dimension_numbers = #tpu.dot_dimension_numbers<[1], [0], [0], [1], [0, 0, 1, 1], [], []>} : vector<144x4xf32>, vector<4x8xf32>, vector<144x8xf32> -> vector<144x8xf32>
    %20 = arith.addf %11, %19 : vector<144x8xf32>
    %c0_i32_12 = arith.constant 0 : i32
    %21 = arith.addi %1, %c0_i32_12 : i32
    %c2_i32 = arith.constant 2 : i32
    %22 = arith.addi %21, %c2_i32 : i32
    %c0_13 = arith.constant 0 : index
    %23 = arith.index_cast %22 : i32 to index
    %c0_14 = arith.constant 0 : index
    %24 = vector.load %arg2[%c0_13, %23, %c0_14] : memref<1x342x4xf32, #tpu.memory_space<vmem>>, vector<1x144x4xf32>
    %25 = vector.shape_cast %24 : vector<1x144x4xf32> to vector<144x4xf32>
    %c2 = arith.constant 2 : index
    %c0_15 = arith.constant 0 : index
    %c0_16 = arith.constant 0 : index
    %26 = vector.load %arg3[%c2, %c0_15, %c0_16] : memref<9x4x8xf32, #tpu.memory_space<vmem>>, vector<1x4x8xf32>
    %27 = vector.shape_cast %26 : vector<1x4x8xf32> to vector<4x8xf32>
    %cst_17 = arith.constant dense<0.000000e+00> : vector<144x8xf32>
    %28 = tpu.matmul %25, %27, %cst_17 {dimension_numbers = #tpu.dot_dimension_numbers<[1], [0], [0], [1], [0, 0, 1, 1], [], []>} : vector<144x4xf32>, vector<4x8xf32>, vector<144x8xf32> -> vector<144x8xf32>
    %29 = arith.addf %20, %28 : vector<144x8xf32>
    %c18_i32 = arith.constant 18 : i32
    %30 = arith.addi %1, %c18_i32 : i32
    %c0_i32_18 = arith.constant 0 : i32
    %31 = arith.addi %30, %c0_i32_18 : i32
    %c0_19 = arith.constant 0 : index
    %32 = arith.index_cast %31 : i32 to index
    %c0_20 = arith.constant 0 : index
    %33 = vector.load %arg2[%c0_19, %32, %c0_20] : memref<1x342x4xf32, #tpu.memory_space<vmem>>, vector<1x144x4xf32>
    %34 = vector.shape_cast %33 : vector<1x144x4xf32> to vector<144x4xf32>
    %c3 = arith.constant 3 : index
    %c0_21 = arith.constant 0 : index
    %c0_22 = arith.constant 0 : index
    %35 = vector.load %arg3[%c3, %c0_21, %c0_22] : memref<9x4x8xf32, #tpu.memory_space<vmem>>, vector<1x4x8xf32>
    %36 = vector.shape_cast %35 : vector<1x4x8xf32> to vector<4x8xf32>
    %cst_23 = arith.constant dense<0.000000e+00> : vector<144x8xf32>
    %37 = tpu.matmul %34, %36, %cst_23 {dimension_numbers = #tpu.dot_dimension_numbers<[1], [0], [0], [1], [0, 0, 1, 1], [], []>} : vector<144x4xf32>, vector<4x8xf32>, vector<144x8xf32> -> vector<144x8xf32>
    %38 = arith.addf %29, %37 : vector<144x8xf32>
    %c18_i32_24 = arith.constant 18 : i32
    %39 = arith.addi %1, %c18_i32_24 : i32
    %c1_i32_25 = arith.constant 1 : i32
    %40 = arith.addi %39, %c1_i32_25 : i32
    %c0_26 = arith.constant 0 : index
    %41 = arith.index_cast %40 : i32 to index
    %c0_27 = arith.constant 0 : index
    %42 = vector.load %arg2[%c0_26, %41, %c0_27] : memref<1x342x4xf32, #tpu.memory_space<vmem>>, vector<1x144x4xf32>
    %43 = vector.shape_cast %42 : vector<1x144x4xf32> to vector<144x4xf32>
    %c4 = arith.constant 4 : index
    %c0_28 = arith.constant 0 : index
    %c0_29 = arith.constant 0 : index
    %44 = vector.load %arg3[%c4, %c0_28, %c0_29] : memref<9x4x8xf32, #tpu.memory_space<vmem>>, vector<1x4x8xf32>
    %45 = vector.shape_cast %44 : vector<1x4x8xf32> to vector<4x8xf32>
    %cst_30 = arith.constant dense<0.000000e+00> : vector<144x8xf32>
    %46 = tpu.matmul %43, %45, %cst_30 {dimension_numbers = #tpu.dot_dimension_numbers<[1], [0], [0], [1], [0, 0, 1, 1], [], []>} : vector<144x4xf32>, vector<4x8xf32>, vector<144x8xf32> -> vector<144x8xf32>
    %47 = arith.addf %38, %46 : vector<144x8xf32>
    %c18_i32_31 = arith.constant 18 : i32
    %48 = arith.addi %1, %c18_i32_31 : i32
    %c2_i32_32 = arith.constant 2 : i32
    %49 = arith.addi %48, %c2_i32_32 : i32
    %c0_33 = arith.constant 0 : index
    %50 = arith.index_cast %49 : i32 to index
    %c0_34 = arith.constant 0 : index
    %51 = vector.load %arg2[%c0_33, %50, %c0_34] : memref<1x342x4xf32, #tpu.memory_space<vmem>>, vector<1x144x4xf32>
    %52 = vector.shape_cast %51 : vector<1x144x4xf32> to vector<144x4xf32>
    %c5 = arith.constant 5 : index
    %c0_35 = arith.constant 0 : index
    %c0_36 = arith.constant 0 : index
    %53 = vector.load %arg3[%c5, %c0_35, %c0_36] : memref<9x4x8xf32, #tpu.memory_space<vmem>>, vector<1x4x8xf32>
    %54 = vector.shape_cast %53 : vector<1x4x8xf32> to vector<4x8xf32>
    %cst_37 = arith.constant dense<0.000000e+00> : vector<144x8xf32>
    %55 = tpu.matmul %52, %54, %cst_37 {dimension_numbers = #tpu.dot_dimension_numbers<[1], [0], [0], [1], [0, 0, 1, 1], [], []>} : vector<144x4xf32>, vector<4x8xf32>, vector<144x8xf32> -> vector<144x8xf32>
    %56 = arith.addf %47, %55 : vector<144x8xf32>
    %c36_i32 = arith.constant 36 : i32
    %57 = arith.addi %1, %c36_i32 : i32
    %c0_i32_38 = arith.constant 0 : i32
    %58 = arith.addi %57, %c0_i32_38 : i32
    %c0_39 = arith.constant 0 : index
    %59 = arith.index_cast %58 : i32 to index
    %c0_40 = arith.constant 0 : index
    %60 = vector.load %arg2[%c0_39, %59, %c0_40] : memref<1x342x4xf32, #tpu.memory_space<vmem>>, vector<1x144x4xf32>
    %61 = vector.shape_cast %60 : vector<1x144x4xf32> to vector<144x4xf32>
    %c6 = arith.constant 6 : index
    %c0_41 = arith.constant 0 : index
    %c0_42 = arith.constant 0 : index
    %62 = vector.load %arg3[%c6, %c0_41, %c0_42] : memref<9x4x8xf32, #tpu.memory_space<vmem>>, vector<1x4x8xf32>
    %63 = vector.shape_cast %62 : vector<1x4x8xf32> to vector<4x8xf32>
    %cst_43 = arith.constant dense<0.000000e+00> : vector<144x8xf32>
    %64 = tpu.matmul %61, %63, %cst_43 {dimension_numbers = #tpu.dot_dimension_numbers<[1], [0], [0], [1], [0, 0, 1, 1], [], []>} : vector<144x4xf32>, vector<4x8xf32>, vector<144x8xf32> -> vector<144x8xf32>
    %65 = arith.addf %56, %64 : vector<144x8xf32>
    %c36_i32_44 = arith.constant 36 : i32
    %66 = arith.addi %1, %c36_i32_44 : i32
    %c1_i32_45 = arith.constant 1 : i32
    %67 = arith.addi %66, %c1_i32_45 : i32
    %c0_46 = arith.constant 0 : index
    %68 = arith.index_cast %67 : i32 to index
    %c0_47 = arith.constant 0 : index
    %69 = vector.load %arg2[%c0_46, %68, %c0_47] : memref<1x342x4xf32, #tpu.memory_space<vmem>>, vector<1x144x4xf32>
    %70 = vector.shape_cast %69 : vector<1x144x4xf32> to vector<144x4xf32>
    %c7 = arith.constant 7 : index
    %c0_48 = arith.constant 0 : index
    %c0_49 = arith.constant 0 : index
    %71 = vector.load %arg3[%c7, %c0_48, %c0_49] : memref<9x4x8xf32, #tpu.memory_space<vmem>>, vector<1x4x8xf32>
    %72 = vector.shape_cast %71 : vector<1x4x8xf32> to vector<4x8xf32>
    %cst_50 = arith.constant dense<0.000000e+00> : vector<144x8xf32>
    %73 = tpu.matmul %70, %72, %cst_50 {dimension_numbers = #tpu.dot_dimension_numbers<[1], [0], [0], [1], [0, 0, 1, 1], [], []>} : vector<144x4xf32>, vector<4x8xf32>, vector<144x8xf32> -> vector<144x8xf32>
    %74 = arith.addf %65, %73 : vector<144x8xf32>
    %c36_i32_51 = arith.constant 36 : i32
    %75 = arith.addi %1, %c36_i32_51 : i32
    %c2_i32_52 = arith.constant 2 : i32
    %76 = arith.addi %75, %c2_i32_52 : i32
    %c0_53 = arith.constant 0 : index
    %77 = arith.index_cast %76 : i32 to index
    %c0_54 = arith.constant 0 : index
    %78 = vector.load %arg2[%c0_53, %77, %c0_54] : memref<1x342x4xf32, #tpu.memory_space<vmem>>, vector<1x144x4xf32>
    %79 = vector.shape_cast %78 : vector<1x144x4xf32> to vector<144x4xf32>
    %c8 = arith.constant 8 : index
    %c0_55 = arith.constant 0 : index
    %c0_56 = arith.constant 0 : index
    %80 = vector.load %arg3[%c8, %c0_55, %c0_56] : memref<9x4x8xf32, #tpu.memory_space<vmem>>, vector<1x4x8xf32>
    %81 = vector.shape_cast %80 : vector<1x4x8xf32> to vector<4x8xf32>
    %cst_57 = arith.constant dense<0.000000e+00> : vector<144x8xf32>
    %82 = tpu.matmul %79, %81, %cst_57 {dimension_numbers = #tpu.dot_dimension_numbers<[1], [0], [0], [1], [0, 0, 1, 1], [], []>} : vector<144x4xf32>, vector<4x8xf32>, vector<144x8xf32> -> vector<144x8xf32>
    %83 = arith.addf %74, %82 : vector<144x8xf32>
    %c0_58 = arith.constant 0 : index
    %c0_59 = arith.constant 0 : index
    %84 = vector.load %arg4[%c0_58, %c0_59] : memref<1x8xf32, #tpu.memory_space<vmem>>, vector<1x8xf32>
    %85 = vector.broadcast %84 : vector<1x8xf32> to vector<144x8xf32>
    %86 = arith.addf %83, %85 : vector<144x8xf32>
    %87 = math.absf %86 : vector<144x8xf32>
    %cst_60 = arith.constant 1.000000e+00 : f32
    %88 = vector.broadcast %cst_60 : f32 to vector<144x8xf32>
    %89 = arith.addf %88, %87 : vector<144x8xf32>
    %90 = tpu.reciprocal %89 : vector<144x8xf32> -> vector<144x8xf32>
    %91 = arith.mulf %86, %90 : vector<144x8xf32>
    %c0_61 = arith.constant 0 : index
    %c0_62 = arith.constant 0 : index
    %c0_63 = arith.constant 0 : index
    %92 = vector.load %arg5[%c0_61, %c0_62, %c0_63] : memref<1x144x8xf32, #tpu.memory_space<vmem>>, vector<1x144x8xf32>
    %93 = vector.shape_cast %92 : vector<1x144x8xf32> to vector<144x8xf32>
    %94 = vector.shape_cast %91 : vector<144x8xf32> to vector<1x144x8xf32>
    tpu.vector_store %arg5[%c0_61, %c0_62, %c0_63], %94 {strides = array<i32>} : memref<1x144x8xf32, #tpu.memory_space<vmem>>, vector<1x144x8xf32>,
    return
  }
  func.func @transform_0(%arg0: i32, %arg1: i32) -> (i32, i32, i32) {
    %c0_i32 = arith.constant 0 : i32
    %c0_i32_0 = arith.constant 0 : i32
    %c0_i32_1 = arith.constant 0 : i32
    return %arg0, %c0_i32, %c0_i32_0 : i32, i32, i32
  }
  func.func @transform_1(%arg0: i32, %arg1: i32) -> (i32, i32, i32) {
    %c0_i32 = arith.constant 0 : i32
    %c0_i32_0 = arith.constant 0 : i32
    %c0_i32_1 = arith.constant 0 : i32
    %c0_i32_2 = arith.constant 0 : i32
    return %c0_i32, %c0_i32_0, %c0_i32_1 : i32, i32, i32
  }
  func.func @transform_2(%arg0: i32, %arg1: i32) -> (i32, i32) {
    %c0_i32 = arith.constant 0 : i32
    %c0_i32_0 = arith.constant 0 : i32
    %c0_i32_1 = arith.constant 0 : i32
    return %c0_i32, %c0_i32_0 : i32, i32
  }
  func.func @transform_3(%arg0: i32, %arg1: i32) -> (i32, i32, i32) {
    %c0_i32 = arith.constant 0 : i32
    %c0_i32_0 = arith.constant 0 : i32
    return %arg0, %arg1, %c0_i32 : i32, i32, i32
  }
}

</mosaic_0001>

<bundles_post_ra>
// kernel: conv_act.1
= control target key start
LH: loop header
LB: loop body
LE: loop exit
PB: predicated region body
PF: predicated region fallthrough
CT: control target
= control target key end

     0   :  { %s2602_s12 = smov 0   ;;  %s2604_s13 = smov 0   ;;  %s3234_s0 = inlined_call_operand.vmem [shape: f32[2,342,4], index: 0, kind: input, shape index: {}]   ;;  %s3235_s1 = inlined_call_operand.vmem [shape: f32[9,4,8], index: 1, kind: input, shape index: {}]   ;;  %s3236_s2 = inlined_call_operand.vmem [shape: f32[1,8], index: 2, kind: input, shape index: {}]   ;;  %s3237_s3 = inlined_call_operand.vmem [shape: f32[2,288,8], index: 3, kind: output, shape index: {}]  }
   0x1   :  { %s2606_s14 = smov 0   ;;  %s2608_s15 = smov 0  }
   0x2   :  { %s2610_s16 = smov 0  }
   0x3 LB: > { %s22_s17 = sadd.s32 1, %s2572_s14  ;;  %s25_s18 = sadd.s32 1, %s2576_s15  ;;  %s2580_s16 = sphi %s2610_s16, %s13_s16   ;;  %s2576_s15 = sphi %s2608_s15, %s3241_s15   ;;  %s2572_s14 = sphi %s2606_s14, %s3240_s14   ;;  %s2568_s13 = sphi %s2604_s13, %s3239_s13   ;;  %s2564_s12 = sphi %s2602_s12, %s3238_s12  }
   0x4   : > { %p23_p0 = scmp.ge.s32.totalorder %s22_s17, 2  ;;  %p2132_p1 = scmp.ge.s32.totalorder %s2580_s16, 1 }
   0x5   : > { %p151_p2 = scmp.lt.s32.totalorder %s2580_s16, 5 }
   0x6   : > { %s3243_s17 = smov (%p23_p0, %s22_s17), 0  ;;  %s3245_s18 = smov (!%p23_p0, %s25_s18), %s2576_s15 }
   0x7   : > { %p152_p3 = pnand %p2132_p1, %p151_p2  ;;  %p27_p4 = scmp.ge.s32.totalorder %s3245_s18, 2 }
   0x8   : > { %p179_p5 = scmp.lt.s32.totalorder (!%p152_p3), %s2568_s13, 1  ;;  %s194_s29 = smul.u32 (!%p152_p3), 144, %s2564_s12 }
   0x9   : > { %s3247_s18 = smov (%p27_p4, %s3245_s18), 0  ;;  %155 = sbr.rel (%p152_p3) target bundleno = 505 (0x1f9), region = 32 }
   0xa   : > { %s184_s25 = smul.u32 (!%p152_p3), 18, %s2564_s12 }
   0xc   : > { %p187_p6 = scmp.lt.s32.totalorder (!%p152_p3), %s184_s25, 35 }
   0xe   : > { %v2153_v0 = vld [vmem:[%s3235_s1 + $0x4] sm:$0xf]  ;;  %vm292_vm0 = vcmask 1043456   ;;  %v2210_v1 = vld [vmem:[%s3235_s1 + $0x8] sm:$0xf]  ;;  %s3249_s13 = smov (!%p179_p5, %s2568_s13), 1 }
   0xf   : > { %2460 = vmatpush.msk.msra.mxu1 %vm292_vm0, %v2153_v0  ;;  %2461 = vmatpush.msk.msra.mxu2 %vm292_vm0, %v2153_v0  ;;  %v214_v2 = vld [vmem:[%s3235_s1] sm:$0xf]  ;;  %v2286_v3 = vld [vmem:[%s3235_s1 + $0x10] sm:$0xf]  ;;  %v2248_v4 = vld [vmem:[%s3235_s1 + $0xc] sm:$0xf] }
  0x10   : > { %2154 = vmatpush.msk.msra.mxu0 %vm292_vm0, %v2153_v0  ;;  %2462 = vmatpush.msk.msra.mxu3 %vm292_vm0, %v2153_v0  ;;  %s2463_s30 = smul.u32 344, %s3249_s13  ;;  %vm237_vm1 = vcmask 31744   ;;  %v2362_v13 = vld [vmem:[%s3235_s1 + $0x18] sm:$0xf]  ;;  %v2400_v14 = vld [vmem:[%s3235_s1 + $0x1c] sm:$0xf] }
  0x11   : > { %2211 = vmatpush.msk.msrb.mxu2 %vm292_vm0, %v2210_v1  ;;  %2173 = vmatpush.msk.msrb.mxu1 %vm292_vm0, %v214_v2  ;;  %v2324_v15 = vld [vmem:[%s3235_s1 + $0x14] sm:$0xf]  ;;  %v2438_v20 = vld [vmem:[%s3235_s1 + $0x20] sm:$0xf]  ;;  %s2464_s26 = smul.u32 36, %s3249_s13  ;;  %s3251_s25 = smov (!%p187_p6, %s184_s25), 35 }
  0x12   : > { %2287 = vmatpush.msk.msrb.mxu0 %vm292_vm0, %v2286_v3  ;;  %2249 = vmatpush.msk.msrb.mxu3 %vm292_vm0, %v2248_v4  ;;  %s183_s6 = scalar_lea.vmem %s3234_s0, %s2463_s30  ;;  %vm1999_vm6 = vcmask 64512  }
  0x13   : > { %s2664_s7 = scalar_lea.vmem %s183_s6, %s194_s29  ;;  %s190_s12 = sadd.s32 %s2464_s26, %s3251_s25 }
  0x14   : > { %v2140_v5 = vld [vmem:[%s2664_s7 + $0x29] sm:$0xff]  ;;  %v2145_v6 = vld [vmem:[%s2664_s7 + $0x51] sm:$0xff]  ;;  %v2135_v7 = vld [vmem:[%s2664_s7 + $0x1] sm:$0xff]  ;;  %s2134_s13 = sshll.u32 %s190_s12, 3 }
  0x15   : > { %2160 = vmatmul.msk.f32.vlgmr.msra.gmra.mxu1 %vm237_vm1, %v2140_v5  ;;  %2165 = vmatmul.msk.f32.vlgmr.msra.gmra.mxu2 %vm237_vm1, %v2145_v6  ;;  %v2150_v8 = vld [vmem:[%s2664_s7 + $0x79] sm:$0xff]  ;;  %v2141_v9 = vld [vmem:[%s2664_s7 + $0x31] sm:$0xff]  ;;  %v2136_v11 = vld [vmem:[%s2664_s7 + $0x9] sm:$0xff]  ;;  %s3084_s29 = scalar_lea.vmem %s3237_s3, %s2134_s13 }
  0x16   : > { %2155 = vmatmul.msk.f32.vlgmr.msra.gmra.mxu0 %vm237_vm1, %v2135_v7  ;;  %2170 = vmatmul.msk.f32.vlgmr.msra.gmra.mxu3 %vm237_vm1, %v2150_v8  ;;  %v2146_v10 = vld [vmem:[%s2664_s7 + $0x59] sm:$0xff]  ;;  %v2151_v12 = vld [vmem:[%s2664_s7 + $0x81] sm:$0xff]  ;;  %v2137_v18 = vld [vmem:[%s2664_s7 + $0x11] sm:$0xff] }
  0x17   : > { %2363 = vmatpush.msk.msra.mxu2 %vm292_vm0, %v2362_v13  ;;  %2325 = vmatpush.msk.msra.mxu1 %vm292_vm0, %v2324_v15  ;;  %v2142_v16 = vld [vmem:[%s2664_s7 + $0x39] sm:$0xff]  ;;  %v2147_v17 = vld [vmem:[%s2664_s7 + $0x61] sm:$0xff]  ;;  %v2152_v19 = vld [vmem:[%s2664_s7 + $0x89] sm:$0xff] }
  0x18   : > { %2401 = vmatpush.msk.msra.mxu3 %vm292_vm0, %v2400_v14  ;;  %2439 = vmatpush.msk.msra.mxu0 %vm292_vm0, %v2438_v20  ;;  %v2143_v21 = vld [vmem:[%s2664_s7 + $0x41] sm:$0xff]  ;;  %v2148_v22 = vld [vmem:[%s2664_s7 + $0x69] sm:$0xff]  ;;  %v2138_v23 = vld [vmem:[%s2664_s7 + $0x19] sm:$0xff] }
  0x19   : > { %v2230_v24 = vld [vmem:[%s2664_s7 + $0x12] sm:$0xff]  ;;  %v2144_v25 = vld [vmem:[%s2664_s7 + $0x49] sm:$0xff]  ;;  %v2139_v27 = vld [vmem:[%s2664_s7 + $0x21] sm:$0xff] }
  0x1a   : > { %v2149_v26 = vld [vmem:[%s2664_s7 + $0x71] sm:$0xff]  ;;  %v2231_v28 = vld [vmem:[%s2664_s7 + $0x1a] sm:$0xff]  ;;  %v2192_v30 = vld [vmem:[%s2664_s7 + $0x2] sm:$0xff] }
  0x1b   : > { %v196_v29 = vld [vmem:[%s2664_s7] sm:$0xff]  ;;  %v2268_v31 = vld [vmem:[%s2664_s7 + $0x13] sm:$0xff]  ;;  %v197_v33 = vld [vmem:[%s2664_s7 + $0x8] sm:$0xff] }
  0x1c   : > { %v2232_v32 = vld [vmem:[%s2664_s7 + $0x22] sm:$0xff]  ;;  %v2193_v34 = vld [vmem:[%s2664_s7 + $0xa] sm:$0xff]  ;;  %v2234_v39 = vld [vmem:[%s2664_s7 + $0x32] sm:$0xff] }
  0x1d   : > { %2161 = vmatmul.msk.f32.gmra.mxu1 %vm237_vm1, %v2141_v9  ;;  %2166 = vmatmul.msk.f32.gmra.mxu2 %vm237_vm1, %v2146_v10  ;;  %v2269_v35 = vld [vmem:[%s2664_s7 + $0x1b] sm:$0xff]  ;;  %v2233_v36 = vld [vmem:[%s2664_s7 + $0x2a] sm:$0xff]  ;;  %v2272_v44 = vld [vmem:[%s2664_s7 + $0x33] sm:$0xff] }
  0x1e   : > { %2156 = vmatmul.msk.f32.gmra.mxu0 %vm237_vm1, %v2136_v11  ;;  %2171 = vmatmul.msk.f32.gmra.mxu3 %vm237_vm1, %v2151_v12  ;;  %v198_v37 = vld [vmem:[%s2664_s7 + $0x10] sm:$0xff]  ;;  %v2270_v38 = vld [vmem:[%s2664_s7 + $0x23] sm:$0xff]  ;;  %v199_v40 = vld [vmem:[%s2664_s7 + $0x18] sm:$0xff] }
  0x1f   : > { %v2271_v41 = vld [vmem:[%s2664_s7 + $0x2b] sm:$0xff]  ;;  %v2235_v42 = vld [vmem:[%s2664_s7 + $0x3a] sm:$0xff]  ;;  %v2236_v45 = vld [vmem:[%s2664_s7 + $0x42] sm:$0xff] }
  0x20   : > { %v200_v43 = vld [vmem:[%s2664_s7 + $0x20] sm:$0xff]  ;;  %v201_v46 = vld [vmem:[%s2664_s7 + $0x28] sm:$0xff]  ;;  %v202_v49 = vld [vmem:[%s2664_s7 + $0x30] sm:$0xff] }
  0x21   : > { %v2273_v47 = vld [vmem:[%s2664_s7 + $0x3b] sm:$0xff]  ;;  %v2237_v48 = vld [vmem:[%s2664_s7 + $0x4a] sm:$0xff]  ;;  %v2238_v51 = vld [vmem:[%s2664_s7 + $0x52] sm:$0xff] }
  0x22   : > { %v2274_v50 = vld [vmem:[%s2664_s7 + $0x43] sm:$0xff]  ;;  %v203_v52 = vld [vmem:[%s2664_s7 + $0x38] sm:$0xff]  ;;  %v2275_v53 = vld [vmem:[%s2664_s7 + $0x4b] sm:$0xff] }
  0x23   : > { %v2239_v54 = vld [vmem:[%s2664_s7 + $0x5a] sm:$0xff]  ;;  %v2240_v57 = vld [vmem:[%s2664_s7 + $0x62] sm:$0xff]  ;;  %v2241_v60 = vld [vmem:[%s2664_s7 + $0x6a] sm:$0xff] }
  0x24   : > { %v204_v55 = vld [vmem:[%s2664_s7 + $0x40] sm:$0xff]  ;;  %v2276_v56 = vld [vmem:[%s2664_s7 + $0x53] sm:$0xff]  ;;  %v205_v58 = vld [vmem:[%s2664_s7 + $0x48] sm:$0xff] }
  0x25   : > { %2162 = vmatmul.msk.f32.gmra.mxu1 %vm237_vm1, %v2142_v16  ;;  %2167 = vmatmul.msk.f32.gmra.mxu2 %vm237_vm1, %v2147_v17  ;;  %v2277_v59 = vld [vmem:[%s2664_s7 + $0x5b] sm:$0xff]  ;;  %v206_v61 = vld [vmem:[%s2664_s7 + $0x50] sm:$0xff]  ;;  %v2278_v62 = vld [vmem:[%s2664_s7 + $0x63] sm:$0xff] }
  0x26   : > { %2157 = vmatmul.msk.f32.gmra.mxu0 %vm237_vm1, %v2137_v18  ;;  %2172 = vmatmul.msk.f32.gmra.mxu3 %vm237_vm1, %v2152_v19  ;;  %v2242_v63 = vld [vmem:[%s2664_s7 + $0x72] sm:$0xff]  ;;  %v2243_v4 = vld [vmem:[%s2664_s7 + $0x7a] sm:$0xff]  ;;  %v2244_v11 = vld [vmem:[%s2664_s7 + $0x82] sm:$0xff] }
  0x27   : > { %v207_v1 = vld [vmem:[%s2664_s7 + $0x58] sm:$0xff]  ;;  %v2279_v3 = vld [vmem:[%s2664_s7 + $0x6b] sm:$0xff]  ;;  %v208_v7 = vld [vmem:[%s2664_s7 + $0x60] sm:$0xff] }
  0x28   : > { %v2280_v10 = vld [vmem:[%s2664_s7 + $0x73] sm:$0xff]  ;;  %v209_v14 = vld [vmem:[%s2664_s7 + $0x68] sm:$0xff]  ;;  %v2281_v17 = vld [vmem:[%s2664_s7 + $0x7b] sm:$0xff] }
  0x29   : > { %v2245_v18 = vld [vmem:[%s2664_s7 + $0x8a] sm:$0xff] }
  0x2d   : > { %2163 = vmatmul.msk.f32.gmra.mxu1 %vm237_vm1, %v2143_v21  ;;  %2168 = vmatmul.msk.f32.gmra.mxu2 %vm237_vm1, %v2148_v22  ;;  %v210_v21 = vld [vmem:[%s2664_s7 + $0x70] sm:$0xff] }
  0x2e   : > { %2158 = vmatmul.msk.f32.gmra.mxu0 %vm237_vm1, %v2138_v23  ;;  %2250 = vmatmul.msk.f32.vlgmr.msrb.gmra.mxu3 %vm237_vm1, %v2230_v24 }
  0x35   : > { %2164 = vmatmul.msk.f32.gmra.mxu1 %vm237_vm1, %v2144_v25  ;;  %2169 = vmatmul.msk.f32.gmra.mxu2 %vm237_vm1, %v2149_v26  ;;  %v2246_v25 = vld [vmem:[%s2664_s7 + $0x92] sm:$0xff] }
  0x36   : > { %2159 = vmatmul.msk.f32.gmra.mxu0 %vm237_vm1, %v2139_v27  ;;  %2251 = vmatmul.msk.f32.gmra.mxu3 %vm237_vm1, %v2231_v28 }
  0x3d   : > { %2174 = vmatmul.msk.f32.vlgmr.msrb.gmra.mxu1 %vm237_vm1, %v196_v29  ;;  %2212 = vmatmul.msk.f32.vlgmr.msrb.gmra.mxu2 %vm237_vm1, %v2192_v30 }
  0x3e   : > { %2288 = vmatmul.msk.f32.vlgmr.msrb.gmra.mxu0 %vm237_vm1, %v2268_v31  ;;  %2252 = vmatmul.msk.f32.gmra.mxu3 %vm237_vm1, %v2232_v32  ;;  %v2283_v31 = vld [vmem:[%s2664_s7 + $0x8b] sm:$0xff] }
  0x45   : > { %2175 = vmatmul.msk.f32.gmra.mxu1 %vm237_vm1, %v197_v33  ;;  %2213 = vmatmul.msk.f32.gmra.mxu2 %vm237_vm1, %v2193_v34 }
  0x46   : > { %2289 = vmatmul.msk.f32.gmra.mxu0 %vm237_vm1, %v2269_v35  ;;  %2253 = vmatmul.msk.f32.gmra.mxu3 %vm237_vm1, %v2233_v36  ;;  %v212_v35 = vld [vmem:[%s2664_s7 + $0x80] sm:$0xff] }
  0x4d   : > { %2176 = vmatmul.msk.f32.gmra.mxu1 %vm237_vm1, %v198_v37  ;;  %2214 = vmatmul.msk.f32.gmra.mxu2 %vm237_vm1, %v2230_v24  ;;  %v2282_v24 = vld [vmem:[%s2664_s7 + $0x83] sm:$0xff] }
  0x4e   : > { %2290 = vmatmul.msk.f32.gmra.mxu0 %vm237_vm1, %v2270_v38  ;;  %2254 = vmatmul.msk.f32.gmra.mxu3 %vm237_vm1, %v2234_v39  ;;  %v2284_v38 = vld [vmem:[%s2664_s7 + $0x93] sm:$0xff] }
  0x55   : > { %2177 = vmatmul.msk.f32.gmra.mxu1 %vm237_vm1, %v199_v40  ;;  %2215 = vmatmul.msk.f32.gmra.mxu2 %vm237_vm1, %v2231_v28  ;;  %v211_v28 = vld [vmem:[%s2664_s7 + $0x78] sm:$0xff] }
  0x56   : > { %2291 = vmatmul.msk.f32.gmra.mxu0 %vm237_vm1, %v2271_v41  ;;  %2255 = vmatmul.msk.f32.gmra.mxu3 %vm237_vm1, %v2235_v42 }
  0x5d   : > { %2178 = vmatmul.msk.f32.gmra.mxu1 %vm237_vm1, %v200_v43  ;;  %2216 = vmatmul.msk.f32.gmra.mxu2 %vm237_vm1, %v2232_v32  ;;  %v2247_v32 = vld [vmem:[%s2664_s7 + $0x9a] sm:$0xff] }
  0x5e   : > { %2292 = vmatmul.msk.f32.gmra.mxu0 %vm237_vm1, %v2272_v44  ;;  %2256 = vmatmul.msk.f32.gmra.mxu3 %vm237_vm1, %v2236_v45  ;;  %v213_v44 = vld [vmem:[%s2664_s7 + $0x88] sm:$0xff] }
  0x65   : > { %2179 = vmatmul.msk.f32.gmra.mxu1 %vm237_vm1, %v201_v46  ;;  %2217 = vmatmul.msk.f32.gmra.mxu2 %vm237_vm1, %v2233_v36 }
  0x66   : > { %2293 = vmatmul.msk.f32.gmra.mxu0 %vm237_vm1, %v2273_v47  ;;  %2257 = vmatmul.msk.f32.gmra.mxu3 %vm237_vm1, %v2237_v48 }
  0x6d   : > { %2180 = vmatmul.msk.f32.gmra.mxu1 %vm237_vm1, %v202_v49  ;;  %2218 = vmatmul.msk.f32.gmra.mxu2 %vm237_vm1, %v2234_v39  ;;  %v2382_v39 = vld [vmem:[%s2664_s7 + $0x25] sm:$0xff]  ;;  %v2383_v49 = vld [vmem:[%s2664_s7 + $0x2d] sm:$0xff] }
  0x6e   : > { %2294 = vmatmul.msk.f32.gmra.mxu0 %vm237_vm1, %v2274_v50  ;;  %2258 = vmatmul.msk.f32.gmra.mxu3 %vm237_vm1, %v2238_v51 }
  0x75   : > { %2181 = vmatmul.msk.f32.gmra.mxu1 %vm237_vm1, %v203_v52  ;;  %2219 = vmatmul.msk.f32.gmra.mxu2 %vm237_vm1, %v2235_v42 }
  0x76   : > { %2295 = vmatmul.msk.f32.gmra.mxu0 %vm237_vm1, %v2275_v53  ;;  %2259 = vmatmul.msk.f32.gmra.mxu3 %vm237_vm1, %v2239_v54 }
  0x7d   : > { %2182 = vmatmul.msk.f32.gmra.mxu1 %vm237_vm1, %v204_v55  ;;  %2220 = vmatmul.msk.f32.gmra.mxu2 %vm237_vm1, %v2236_v45  ;;  %v2306_v55 = vld [vmem:[%s2664_s7 + $0x14] sm:$0xff] }
  0x7e   : > { %2296 = vmatmul.msk.f32.gmra.mxu0 %vm237_vm1, %v2276_v56  ;;  %2260 = vmatmul.msk.f32.gmra.mxu3 %vm237_vm1, %v2240_v57  ;;  %v2344_v56 = vld [vmem:[%s2664_s7 + $0x24] sm:$0xff] }
  0x85   : > { %2183 = vmatmul.msk.f32.gmra.mxu1 %vm237_vm1, %v205_v58  ;;  %2221 = vmatmul.msk.f32.gmra.mxu2 %vm237_vm1, %v2237_v48  ;;  %v2285_v48 = vld [vmem:[%s2664_s7 + $0x9b] sm:$0xff] }
  0x86   : > { %2297 = vmatmul.msk.f32.gmra.mxu0 %vm237_vm1, %v2277_v59  ;;  %2261 = vmatmul.msk.f32.gmra.mxu3 %vm237_vm1, %v2241_v60 }
  0x8d   : > { %2184 = vmatmul.msk.f32.gmra.mxu1 %vm237_vm1, %v206_v61  ;;  %2222 = vmatmul.msk.f32.gmra.mxu2 %vm237_vm1, %v2238_v51  ;;  %v2384_v61 = vld [vmem:[%s2664_s7 + $0x35] sm:$0xff] }
  0x8e   : > { %2298 = vmatmul.msk.f32.gmra.mxu0 %vm237_vm1, %v2278_v62  ;;  %2262 = vmatmul.msk.f32.gmra.mxu3 %vm237_vm1, %v2242_v63 }
  0x92   : > { %v2801_v0 = vpop.f32.mrf.mxu1 }
  0x93   : > { %v313_v2 = vpop.f32.mrf.mxu0 }
  0x95   : > { %2185 = vmatmul.msk.f32.gmra.mxu1 %vm237_vm1, %v207_v1  ;;  %2223 = vmatmul.msk.f32.gmra.mxu2 %vm237_vm1, %v2239_v54 }
  0x96   : > { %2299 = vmatmul.msk.f32.gmra.mxu0 %vm237_vm1, %v2279_v3  ;;  %2263 = vmatmul.msk.f32.gmra.mxu3 %vm237_vm1, %v2243_v4 }
  0x98   : > { %v2810_v5 = vpop.f32.mrf.mxu2 }
  0x99   : > { %v2815_v8 = vpop.f32.mrf.mxu3 }
  0x9a   : > { %v2812_v6 = vpop.f32.mrf.mxu1 }
  0x9b   : > { %v2817_v9 = vpop.f32.mrf.mxu0 }
  0x9d   : > { %2186 = vmatmul.msk.f32.gmra.mxu1 %vm237_vm1, %v208_v7  ;;  %2224 = vmatmul.msk.f32.gmra.mxu2 %vm237_vm1, %v2240_v57  ;;  %v2345_v7 = vld [vmem:[%s2664_s7 + $0x2c] sm:$0xff] }
  0x9e   : > { %2300 = vmatmul.msk.f32.gmra.mxu0 %vm237_vm1, %v2280_v10  ;;  %2264 = vmatmul.msk.f32.gmra.mxu3 %vm237_vm1, %v2244_v11 }
  0xa0   : > { %v2825_v12 = vpop.f32.mrf.mxu2 }
  0xa1   : > { %v2830_v15 = vpop.f32.mrf.mxu3 }
  0xa2   : > { %v2827_v13 = vpop.f32.mrf.mxu1 }
  0xa3   : > { %v2832_v16 = vpop.f32.mrf.mxu0 }
  0xa5   : > { %2187 = vmatmul.msk.f32.gmra.mxu1 %vm237_vm1, %v209_v14  ;;  %2225 = vmatmul.msk.f32.gmra.mxu2 %vm237_vm1, %v2241_v60  ;;  %v2420_v60 = vld [vmem:[%s2664_s7 + $0x26] sm:$0xff]  ;;  %v2421_v14 = vld [vmem:[%s2664_s7 + $0x2e] sm:$0xff] }
  0xa6   : > { %2301 = vmatmul.msk.f32.gmra.mxu0 %vm237_vm1, %v2281_v17  ;;  %2265 = vmatmul.msk.f32.gmra.mxu3 %vm237_vm1, %v2245_v18  ;;  %v2385_v17 = vld [vmem:[%s2664_s7 + $0x3d] sm:$0xff] }
  0xa8   : > { %v2840_v19 = vpop.f32.mrf.mxu2 }
  0xa9   : > { %v2845_v22 = vpop.f32.mrf.mxu3 }
  0xaa   : > { %v2842_v20 = vpop.f32.mrf.mxu1 }
  0xab   : > { %v2847_v23 = vpop.f32.mrf.mxu0 }
  0xad   : > { %2188 = vmatmul.msk.f32.gmra.mxu1 %vm237_vm1, %v210_v21  ;;  %2226 = vmatmul.msk.f32.gmra.mxu2 %vm237_vm1, %v2242_v63 }
  0xae   : > { %2302 = vmatmul.msk.f32.gmra.mxu0 %vm237_vm1, %v2282_v24  ;;  %2266 = vmatmul.msk.f32.gmra.mxu3 %vm237_vm1, %v2246_v25 }
  0xb0   : > { %v2855_v26 = vpop.f32.mrf.mxu2 }
  0xb1   : > { %v759_v29 = vpop.f32.mrf.mxu3 }
  0xb2   : > { %v2857_v27 = vpop.f32.mrf.mxu1 }
  0xb3   : > { %v2860_v30 = vpop.f32.mrf.mxu0 }
  0xb5   : > { %2189 = vmatmul.msk.f32.gmra.mxu1 %vm237_vm1, %v211_v28  ;;  %2227 = vmatmul.msk.f32.gmra.mxu2 %vm237_vm1, %v2243_v4  ;;  %v2307_v4 = vld [vmem:[%s2664_s7 + $0x1c] sm:$0xff]  ;;  %v2346_v28 = vld [vmem:[%s2664_s7 + $0x34] sm:$0xff] }
  0xb6   : > { %2303 = vmatmul.msk.f32.gmra.mxu0 %vm237_vm1, %v2283_v31  ;;  %2267 = vmatmul.msk.f32.gmra.mxu3 %vm237_vm1, %v2247_v32 }
  0xb8   : > { %v2868_v33 = vpop.f32.mrf.mxu2 }
  0xb9   : > { %v762_v36 = vpop.f32.mrf.mxu3 }
  0xba   : > { %v441_v34 = vpop.f32.mrf.mxu1 }
  0xbb   : > { %v927_v37 = vpop.f32.mrf.mxu0  ;;  %v442_v40 = vadd.f32 %v441_v34, %v313_v2  ;;  %v2422_v34 = vld [vmem:[%s2664_s7 + $0x36] sm:$0xff] }
  0xbd   : > { %2190 = vmatmul.msk.f32.gmra.mxu1 %vm237_vm1, %v212_v35  ;;  %2228 = vmatmul.msk.f32.gmra.mxu2 %vm237_vm1, %v2244_v11  ;;  %v2386_v35 = vld [vmem:[%s2664_s7 + $0x45] sm:$0xff] }
  0xbe   : > { %2304 = vmatmul.msk.f32.gmra.mxu0 %vm237_vm1, %v2284_v38  ;;  %2402 = vmatmul.msk.f32.vlgmr.msra.gmra.mxu3 %vm237_vm1, %v2382_v39 }
  0xc0   : > { %v591_v41 = vpop.f32.mrf.mxu2 }
  0xc1   : > { %v645_v42 = vadd.f32 %v591_v41, %v442_v40  ;;  %v765_v45 = vpop.f32.mrf.mxu3  ;;  %v2347_v40 = vld [vmem:[%s2664_s7 + $0x3c] sm:$0xff] }
  0xc2   : > { %v444_v43 = vpop.f32.mrf.mxu1 }
  0xc3   : > { %v813_v46 = vadd.f32 %v759_v29, %v645_v42  ;;  %v930_v47 = vpop.f32.mrf.mxu0  ;;  %v445_v51 = vadd.f32 %v444_v43, %v2817_v9 }
  0xc5   : > { %v2880_v50 = vadd.f32 %v927_v37, %v813_v46  ;;  %2191 = vmatmul.msk.f32.gmra.mxu1 %vm237_vm1, %v213_v44  ;;  %2229 = vmatmul.msk.f32.gmra.mxu2 %vm237_vm1, %v2245_v18  ;;  %v2423_v44 = vld [vmem:[%s2664_s7 + $0x3e] sm:$0xff] }
  0xc6   : > { %2305 = vmatmul.msk.f32.gmra.mxu0 %vm237_vm1, %v2285_v48  ;;  %2403 = vmatmul.msk.f32.gmra.mxu3 %vm237_vm1, %v2383_v49 }
  0xc8   : > { %v594_v52 = vpop.f32.mrf.mxu2 }
  0xc9   : > { %v646_v53 = vadd.f32 %v594_v52, %v445_v51  ;;  %v768_v57 = vpop.f32.mrf.mxu3  ;;  %v2348_v51 = vld [vmem:[%s2664_s7 + $0x44] sm:$0xff] }
  0xca   : > { %v447_v54 = vpop.f32.mrf.mxu1 }
  0xcb   : > { %v814_v58 = vadd.f32 %v762_v36, %v646_v53  ;;  %v933_v59 = vpop.f32.mrf.mxu0  ;;  %v448_v63 = vadd.f32 %v447_v54, %v2832_v16 }
  0xcd   : > { %v2891_v62 = vadd.f32 %v930_v47, %v814_v58  ;;  %2326 = vmatmul.msk.f32.vlgmr.msra.gmra.mxu1 %vm237_vm1, %v2306_v55  ;;  %2364 = vmatmul.msk.f32.vlgmr.msra.gmra.mxu2 %vm237_vm1, %v2344_v56  ;;  %v2424_v55 = vld [vmem:[%s2664_s7 + $0x46] sm:$0xff] }
  0xce   : > { %2440 = vmatmul.msk.f32.vlgmr.msra.gmra.mxu0 %vm237_vm1, %v2420_v60  ;;  %2404 = vmatmul.msk.f32.gmra.mxu3 %vm237_vm1, %v2384_v61  ;;  %v2349_v61 = vld [vmem:[%s2664_s7 + $0x4c] sm:$0xff] }
  0xd0   : > { %v597_v1 = vpop.f32.mrf.mxu2 }
  0xd1   : > { %v647_v2 = vadd.f32 %v597_v1, %v448_v63  ;;  %v771_v9 = vpop.f32.mrf.mxu3 }
  0xd2   : > { %v450_v3 = vpop.f32.mrf.mxu1 }
  0xd3   : > { %v815_v10 = vadd.f32 %v765_v45, %v647_v2  ;;  %v936_v11 = vpop.f32.mrf.mxu0  ;;  %v451_v16 = vadd.f32 %v450_v3, %v2847_v23  ;;  %v2387_v45 = vld [vmem:[%s2664_s7 + $0x4d] sm:$0xff] }
  0xd4   : > { %v2425_v3 = vld [vmem:[%s2664_s7 + $0x4e] sm:$0xff] }
  0xd5   : > { %v2902_v18 = vadd.f32 %v933_v59, %v815_v10  ;;  %2327 = vmatmul.msk.f32.gmra.mxu1 %vm237_vm1, %v2307_v4  ;;  %2365 = vmatmul.msk.f32.gmra.mxu2 %vm237_vm1, %v2345_v7  ;;  %v2389_v4 = vld [vmem:[%s2664_s7 + $0x5d] sm:$0xff] }
  0xd6   : > { %2441 = vmatmul.msk.f32.gmra.mxu0 %vm237_vm1, %v2421_v14  ;;  %2405 = vmatmul.msk.f32.gmra.mxu3 %vm237_vm1, %v2385_v17  ;;  %v2350_v14 = vld [vmem:[%s2664_s7 + $0x54] sm:$0xff] }
  0xd8   : > { %v600_v21 = vpop.f32.mrf.mxu2 }
  0xd9   : > { %v648_v24 = vadd.f32 %v600_v21, %v451_v16  ;;  %v774_v29 = vpop.f32.mrf.mxu3 }
  0xda   : > { %v453_v25 = vpop.f32.mrf.mxu1 }
  0xdb   : > { %v816_v31 = vadd.f32 %v768_v57, %v648_v24  ;;  %v939_v32 = vpop.f32.mrf.mxu0  ;;  %v454_v23 = vadd.f32 %v453_v25, %v2860_v30  ;;  %v2426_v24 = vld [vmem:[%s2664_s7 + $0x56] sm:$0xff]  ;;  %v2390_v25 = vld [vmem:[%s2664_s7 + $0x65] sm:$0xff] }
  0xdd   : > { %v2912_v36 = vadd.f32 %v936_v11, %v816_v31  ;;  %2328 = vmatmul.msk.f32.gmra.mxu1 %vm237_vm1, %v2344_v56  ;;  %2366 = vmatmul.msk.f32.gmra.mxu2 %vm237_vm1, %v2346_v28  ;;  %v2388_v56 = vld [vmem:[%s2664_s7 + $0x55] sm:$0xff] }
  0xde   : > { %2442 = vmatmul.msk.f32.gmra.mxu0 %vm237_vm1, %v2422_v34  ;;  %2406 = vmatmul.msk.f32.gmra.mxu3 %vm237_vm1, %v2386_v35  ;;  %v2351_v34 = vld [vmem:[%s2664_s7 + $0x5c] sm:$0xff] }
  0xe0   : > { %v603_v37 = vpop.f32.mrf.mxu2 }
  0xe1   : > { %v649_v38 = vadd.f32 %v603_v37, %v454_v23  ;;  %v777_v41 = vpop.f32.mrf.mxu3 }
  0xe2   : > { %v456_v39 = vpop.f32.mrf.mxu1 }
  0xe3   : > { %v817_v42 = vadd.f32 %v771_v9, %v649_v38  ;;  %v942_v43 = vpop.f32.mrf.mxu0  ;;  %v457_v30 = vadd.f32 %v456_v39, %v2801_v0  ;;  %v2427_v38 = vld [vmem:[%s2664_s7 + $0x5e] sm:$0xff]  ;;  %v2391_v39 = vld [vmem:[%s2664_s7 + $0x6d] sm:$0xff] }
  0xe5   : > { %v2922_v46 = vadd.f32 %v939_v32, %v817_v42  ;;  %2329 = vmatmul.msk.f32.gmra.mxu1 %vm237_vm1, %v2345_v7  ;;  %2367 = vmatmul.msk.f32.gmra.mxu2 %vm237_vm1, %v2347_v40 }
  0xe6   : > { %2443 = vmatmul.msk.f32.gmra.mxu0 %vm237_vm1, %v2423_v44  ;;  %2407 = vmatmul.msk.f32.gmra.mxu3 %vm237_vm1, %v2387_v45  ;;  %v2352_v44 = vld [vmem:[%s2664_s7 + $0x64] sm:$0xff] }
  0xe8   : > { %v606_v47 = vpop.f32.mrf.mxu2 }
  0xe9   : > { %v650_v48 = vadd.f32 %v606_v47, %v457_v30  ;;  %v780_v52 = vpop.f32.mrf.mxu3 }
  0xea   : > { %v459_v49 = vpop.f32.mrf.mxu1 }
  0xeb   : > { %v818_v53 = vadd.f32 %v774_v29, %v650_v48  ;;  %v945_v54 = vpop.f32.mrf.mxu0  ;;  %v460_v0 = vadd.f32 %v459_v49, %v2812_v6  ;;  %v2428_v48 = vld [vmem:[%s2664_s7 + $0x66] sm:$0xff]  ;;  %v2392_v49 = vld [vmem:[%s2664_s7 + $0x75] sm:$0xff] }
  0xed   : > { %v2932_v57 = vadd.f32 %v942_v43, %v818_v53  ;;  %2330 = vmatmul.msk.f32.gmra.mxu1 %vm237_vm1, %v2346_v28  ;;  %2368 = vmatmul.msk.f32.gmra.mxu2 %vm237_vm1, %v2348_v51 }
  0xee   : > { %2444 = vmatmul.msk.f32.gmra.mxu0 %vm237_vm1, %v2424_v55  ;;  %2408 = vmatmul.msk.f32.gmra.mxu3 %vm237_vm1, %v2388_v56  ;;  %v2353_v55 = vld [vmem:[%s2664_s7 + $0x6c] sm:$0xff] }
  0xf0   : > { %v609_v58 = vpop.f32.mrf.mxu2 }
  0xf1   : > { %v651_v59 = vadd.f32 %v609_v58, %v460_v0  ;;  %v783_v63 = vpop.f32.mrf.mxu3 }
  0xf2   : > { %v462_v60 = vpop.f32.mrf.mxu1 }
  0xf3   : > { %v819_v1 = vadd.f32 %v777_v41, %v651_v59  ;;  %v948_v2 = vpop.f32.mrf.mxu0  ;;  %v463_v6 = vadd.f32 %v462_v60, %v2827_v13  ;;  %v2429_v59 = vld [vmem:[%s2664_s7 + $0x6e] sm:$0xff]  ;;  %v2393_v60 = vld [vmem:[%s2664_s7 + $0x7d] sm:$0xff] }
  0xf5   : > { %v2942_v7 = vadd.f32 %v945_v54, %v819_v1  ;;  %2331 = vmatmul.msk.f32.gmra.mxu1 %vm237_vm1, %v2347_v40  ;;  %2369 = vmatmul.msk.f32.gmra.mxu2 %vm237_vm1, %v2349_v61 }
  0xf6   : > { %2445 = vmatmul.msk.f32.gmra.mxu0 %vm237_vm1, %v2425_v3  ;;  %2409 = vmatmul.msk.f32.gmra.mxu3 %vm237_vm1, %v2389_v4  ;;  %v2354_v3 = vld [vmem:[%s2664_s7 + $0x74] sm:$0xff] }
  0xf8   : > { %v612_v9 = vpop.f32.mrf.mxu2 }
  0xf9   : > { %v652_v10 = vadd.f32 %v612_v9, %v463_v6  ;;  %v786_v17 = vpop.f32.mrf.mxu3 }
  0xfa   : > { %v465_v11 = vpop.f32.mrf.mxu1 }
  0xfb   : > { %v820_v16 = vadd.f32 %v780_v52, %v652_v10  ;;  %v951_v21 = vpop.f32.mrf.mxu0  ;;  %v466_v13 = vadd.f32 %v465_v11, %v2842_v20  ;;  %v2430_v10 = vld [vmem:[%s2664_s7 + $0x76] sm:$0xff]  ;;  %v2394_v11 = vld [vmem:[%s2664_s7 + $0x85] sm:$0xff] }
  0xfd   : > { %v2952_v28 = vadd.f32 %v948_v2, %v820_v16  ;;  %2332 = vmatmul.msk.f32.gmra.mxu1 %vm237_vm1, %v2348_v51  ;;  %2370 = vmatmul.msk.f32.gmra.mxu2 %vm237_vm1, %v2350_v14 }
  0xfe   : > { %2446 = vmatmul.msk.f32.gmra.mxu0 %vm237_vm1, %v2426_v24  ;;  %2410 = vmatmul.msk.f32.gmra.mxu3 %vm237_vm1, %v2390_v25  ;;  %v2355_v24 = vld [vmem:[%s2664_s7 + $0x7c] sm:$0xff] }
 0x100   : > { %v615_v29 = vpop.f32.mrf.mxu2 }
 0x101   : > { %v653_v31 = vadd.f32 %v615_v29, %v466_v13  ;;  %v789_v35 = vpop.f32.mrf.mxu3 }
 0x102   : > { %v468_v32 = vpop.f32.mrf.mxu1 }
 0x103   : > { %v821_v23 = vadd.f32 %v783_v63, %v653_v31  ;;  %v954_v37 = vpop.f32.mrf.mxu0  ;;  %v469_v20 = vadd.f32 %v468_v32, %v2857_v27  ;;  %v2431_v31 = vld [vmem:[%s2664_s7 + $0x7e] sm:$0xff]  ;;  %v2395_v32 = vld [vmem:[%s2664_s7 + $0x8d] sm:$0xff] }
 0x105   : > { %v2962_v40 = vadd.f32 %v951_v21, %v821_v23  ;;  %2333 = vmatmul.msk.f32.gmra.mxu1 %vm237_vm1, %v2349_v61  ;;  %2371 = vmatmul.msk.f32.gmra.mxu2 %vm237_vm1, %v2351_v34 }
 0x106   : > { %2447 = vmatmul.msk.f32.gmra.mxu0 %vm237_vm1, %v2427_v38  ;;  %2411 = vmatmul.msk.f32.gmra.mxu3 %vm237_vm1, %v2391_v39  ;;  %v2356_v38 = vld [vmem:[%s2664_s7 + $0x84] sm:$0xff] }
 0x108   : > { %v618_v41 = vpop.f32.mrf.mxu2 }
 0x109   : > { %v654_v42 = vadd.f32 %v618_v41, %v469_v20  ;;  %v792_v45 = vpop.f32.mrf.mxu3 }
 0x10a   : > { %v471_v43 = vpop.f32.mrf.mxu1 }
 0x10b   : > { %v822_v30 = vadd.f32 %v786_v17, %v654_v42  ;;  %v957_v47 = vpop.f32.mrf.mxu0  ;;  %v472_v27 = vadd.f32 %v471_v43, %v2810_v5  ;;  %v2432_v42 = vld [vmem:[%s2664_s7 + $0x86] sm:$0xff]  ;;  %v2396_v43 = vld [vmem:[%s2664_s7 + $0x95] sm:$0xff] }
 0x10d   : > { %v2972_v51 = vadd.f32 %v954_v37, %v822_v30  ;;  %2334 = vmatmul.msk.f32.gmra.mxu1 %vm237_vm1, %v2350_v14  ;;  %2372 = vmatmul.msk.f32.gmra.mxu2 %vm237_vm1, %v2352_v44 }
 0x10e   : > { %2448 = vmatmul.msk.f32.gmra.mxu0 %vm237_vm1, %v2428_v48  ;;  %2412 = vmatmul.msk.f32.gmra.mxu3 %vm237_vm1, %v2392_v49  ;;  %v2357_v48 = vld [vmem:[%s2664_s7 + $0x8c] sm:$0xff] }
 0x110   : > { %v621_v52 = vpop.f32.mrf.mxu2 }
 0x111   : > { %v655_v53 = vadd.f32 %v621_v52, %v472_v27  ;;  %v795_v56 = vpop.f32.mrf.mxu3 }
 0x112   : > { %v474_v54 = vpop.f32.mrf.mxu1 }
 0x113   : > { %v823_v0 = vadd.f32 %v789_v35, %v655_v53  ;;  %v960_v58 = vpop.f32.mrf.mxu0  ;;  %v475_v5 = vadd.f32 %v474_v54, %v2825_v12  ;;  %v2433_v53 = vld [vmem:[%s2664_s7 + $0x8e] sm:$0xff]  ;;  %v2397_v54 = vld [vmem:[%s2664_s7 + $0x9d] sm:$0xff] }
 0x115   : > { %v2982_v61 = vadd.f32 %v957_v47, %v823_v0  ;;  %2335 = vmatmul.msk.f32.gmra.mxu1 %vm237_vm1, %v2351_v34  ;;  %2373 = vmatmul.msk.f32.gmra.mxu2 %vm237_vm1, %v2353_v55 }
 0x116   : > { %2449 = vmatmul.msk.f32.gmra.mxu0 %vm237_vm1, %v2429_v59  ;;  %2413 = vmatmul.msk.f32.gmra.mxu3 %vm237_vm1, %v2393_v60  ;;  %v2358_v59 = vld [vmem:[%s2664_s7 + $0x94] sm:$0xff] }
 0x118   : > { %v624_v63 = vpop.f32.mrf.mxu2 }
 0x119   : > { %v656_v1 = vadd.f32 %v624_v63, %v475_v5  ;;  %v798_v4 = vpop.f32.mrf.mxu3 }
 0x11a   : > { %v477_v2 = vpop.f32.mrf.mxu1 }
 0x11b   : > { %v824_v6 = vadd.f32 %v792_v45, %v656_v1  ;;  %v963_v9 = vpop.f32.mrf.mxu0  ;;  %v478_v12 = vadd.f32 %v477_v2, %v2840_v19  ;;  %v2434_v1 = vld [vmem:[%s2664_s7 + $0x96] sm:$0xff]  ;;  %v2398_v2 = vld [vmem:[%s2664_s7 + $0xa5] sm:$0xff] }
 0x11d   : > { %v2992_v14 = vadd.f32 %v960_v58, %v824_v6  ;;  %2336 = vmatmul.msk.f32.gmra.mxu1 %vm237_vm1, %v2352_v44  ;;  %2374 = vmatmul.msk.f32.gmra.mxu2 %vm237_vm1, %v2354_v3 }
 0x11e   : > { %2450 = vmatmul.msk.f32.gmra.mxu0 %vm237_vm1, %v2430_v10  ;;  %2414 = vmatmul.msk.f32.gmra.mxu3 %vm237_vm1, %v2394_v11  ;;  %v2359_v10 = vld [vmem:[%s2664_s7 + $0x9c] sm:$0xff] }
 0x120   : > { %v627_v17 = vpop.f32.mrf.mxu2 }
 0x121   : > { %v657_v16 = vadd.f32 %v627_v17, %v478_v12  ;;  %v801_v25 = vpop.f32.mrf.mxu3 }
 0x122   : > { %v480_v21 = vpop.f32.mrf.mxu1 }
 0x123   : > { %v825_v13 = vadd.f32 %v795_v56, %v657_v16  ;;  %v966_v29 = vpop.f32.mrf.mxu0  ;;  %v481_v19 = vadd.f32 %v480_v21, %v2855_v26  ;;  %v2435_v16 = vld [vmem:[%s2664_s7 + $0x9e] sm:$0xff]  ;;  %v2399_v21 = vld [vmem:[%s2664_s7 + $0xad] sm:$0xff] }
 0x125   : > { %v3002_v34 = vadd.f32 %v963_v9, %v825_v13  ;;  %2337 = vmatmul.msk.f32.gmra.mxu1 %vm237_vm1, %v2353_v55  ;;  %2375 = vmatmul.msk.f32.gmra.mxu2 %vm237_vm1, %v2355_v24 }
 0x126   : > { %2451 = vmatmul.msk.f32.gmra.mxu0 %vm237_vm1, %v2431_v31  ;;  %2415 = vmatmul.msk.f32.gmra.mxu3 %vm237_vm1, %v2395_v32  ;;  %v2360_v31 = vld [vmem:[%s2664_s7 + $0xa4] sm:$0xff] }
 0x128   : > { %v630_v35 = vpop.f32.mrf.mxu2 }
 0x129   : > { %v658_v23 = vadd.f32 %v630_v35, %v481_v19  ;;  %v804_v39 = vpop.f32.mrf.mxu3 }
 0x12a   : > { %v483_v37 = vpop.f32.mrf.mxu1 }
 0x12b   : > { %v826_v20 = vadd.f32 %v798_v4, %v658_v23  ;;  %v969_v41 = vpop.f32.mrf.mxu0  ;;  %v484_v26 = vadd.f32 %v483_v37, %v2868_v33  ;;  %v2436_v23 = vld [vmem:[%s2664_s7 + $0xa6] sm:$0xff] }
 0x12d   : > { %v3012_v44 = vadd.f32 %v966_v29, %v826_v20  ;;  %2338 = vmatmul.msk.f32.gmra.mxu1 %vm237_vm1, %v2354_v3  ;;  %2376 = vmatmul.msk.f32.gmra.mxu2 %vm237_vm1, %v2356_v38 }
 0x12e   : > { %2452 = vmatmul.msk.f32.gmra.mxu0 %vm237_vm1, %v2432_v42  ;;  %2416 = vmatmul.msk.f32.gmra.mxu3 %vm237_vm1, %v2396_v43 }
 0x130   : > { %v633_v45 = vpop.f32.mrf.mxu2 }
 0x131   : > { %v659_v30 = vadd.f32 %v633_v45, %v484_v26  ;;  %v807_v49 = vpop.f32.mrf.mxu3  ;;  %v3061_v26 = vld [vmem:[%s3236_s2] ss:$0 sm:$0xff] }
 0x132   : > { %v486_v47 = vpop.f32.mrf.mxu1 }
 0x133   : > { %v827_v27 = vadd.f32 %v801_v25, %v659_v30  ;;  %v972_v52 = vpop.f32.mrf.mxu0  ;;  %v487_v33 = vadd.f32 %v486_v47, %v2815_v8  ;;  %v2437_v30 = vld [vmem:[%s2664_s7 + $0xae] sm:$0xff] }
 0x135   : > { %v3022_v55 = vadd.f32 %v969_v41, %v827_v27  ;;  %2339 = vmatmul.msk.f32.gmra.mxu1 %vm237_vm1, %v2355_v24  ;;  %2377 = vmatmul.msk.f32.gmra.mxu2 %vm237_vm1, %v2357_v48  ;;  %v2361_v41 = vld [vmem:[%s2664_s7 + $0xac] sm:$0xff] }
 0x136   : > { %2453 = vmatmul.msk.f32.gmra.mxu0 %vm237_vm1, %v2433_v53  ;;  %2417 = vmatmul.msk.f32.gmra.mxu3 %vm237_vm1, %v2397_v54 }
 0x138   : > { %v636_v56 = vpop.f32.mrf.mxu2 }
 0x139   : > { %v660_v0 = vadd.f32 %v636_v56, %v487_v33  ;;  %v810_v60 = vpop.f32.mrf.mxu3 }
 0x13a   : > { %v489_v58 = vpop.f32.mrf.mxu1 }
 0x13b   : > { %v828_v5 = vadd.f32 %v804_v39, %v660_v0  ;;  %v975_v63 = vpop.f32.mrf.mxu0  ;;  %v490_v8 = vadd.f32 %v489_v58, %v2830_v15 }
 0x13d   : > { %v3032_v3 = vadd.f32 %v972_v52, %v828_v5  ;;  %2340 = vmatmul.msk.f32.gmra.mxu1 %vm237_vm1, %v2356_v38  ;;  %2378 = vmatmul.msk.f32.gmra.mxu2 %vm237_vm1, %v2358_v59 }
 0x13e   : > { %2454 = vmatmul.msk.f32.gmra.mxu0 %vm237_vm1, %v2434_v1  ;;  %2418 = vmatmul.msk.f32.gmra.mxu3 %vm237_vm1, %v2398_v2 }
 0x140   : > { %v639_v4 = vpop.f32.mrf.mxu2 }
 0x141   : > { %v661_v6 = vadd.f32 %v639_v4, %v490_v8  ;;  %v1431_v11 = vpop.f32.mrf.mxu3 }
 0x142   : > { %v492_v9 = vpop.f32.mrf.mxu1 }
 0x143   : > { %v829_v12 = vadd.f32 %v807_v49, %v661_v6  ;;  %v978_v17 = vpop.f32.mrf.mxu0  ;;  %v493_v15 = vadd.f32 %v492_v9, %v2845_v22 }
 0x145   : > { %v3042_v24 = vadd.f32 %v975_v63, %v829_v12  ;;  %2341 = vmatmul.msk.f32.gmra.mxu1 %vm237_vm1, %v2357_v48  ;;  %2379 = vmatmul.msk.f32.gmra.mxu2 %vm237_vm1, %v2359_v10 }
 0x146   : > { %2455 = vmatmul.msk.f32.gmra.mxu0 %vm237_vm1, %v2435_v16  ;;  %2419 = vmatmul.msk.f32.gmra.mxu3 %vm237_vm1, %v2399_v21 }
 0x148   : > { %v642_v25 = vpop.f32.mrf.mxu2 }
 0x149   : > { %v662_v13 = vadd.f32 %v642_v25, %v493_v15  ;;  %v1434_v32 = vpop.f32.mrf.mxu3 }
 0x14a   : > { %v1095_v29 = vpop.f32.mrf.mxu1 }
 0x14b   : > { %v830_v19 = vadd.f32 %v810_v60, %v662_v13  ;;  %v1599_v35 = vpop.f32.mrf.mxu0  ;;  %v1149_v22 = vadd.f32 %v1095_v29, %v2880_v50 }
 0x14d   : > { %v3051_v37 = vadd.f32 %v978_v17, %v830_v19  ;;  %2342 = vmatmul.msk.f32.gmra.mxu1 %vm237_vm1, %v2358_v59  ;;  %2380 = vmatmul.msk.f32.gmra.mxu2 %vm237_vm1, %v2360_v31 }
 0x14e   : > { %2456 = vmatmul.msk.f32.gmra.mxu0 %vm237_vm1, %v2436_v23 }
 0x150   : > { %v1263_v38 = vpop.f32.mrf.mxu2 }
 0x151   : > { %v1317_v39 = vadd.f32 %v1263_v38, %v1149_v22  ;;  %v1437_v42 = vpop.f32.mrf.mxu3 }
 0x152   : > { %v1098_v20 = vpop.f32.mrf.mxu1 }
 0x153   : > { %v1485_v43 = vadd.f32 %v1431_v11, %v1317_v39  ;;  %v1602_v45 = vpop.f32.mrf.mxu0  ;;  %v1150_v50 = vadd.f32 %v1098_v20, %v2891_v62 }
 0x155   : > { %v1653_v47 = vadd.f32 %v1599_v35, %v1485_v43  ;;  %2343 = vmatmul.msk.f32.gmra.mxu1 %vm237_vm1, %v2359_v10  ;;  %2381 = vmatmul.msk.f32.gmra.mxu2 %vm237_vm1, %v2361_v41 }
 0x156   : > { %2457 = vmatmul.msk.f32.gmra.mxu0 %vm237_vm1, %v2437_v30 }
 0x157   : > { %v1675_v48 = vadd.f32 %v3061_v26, %v1653_v47 }
 0x158   : > { %v1266_v49 = vpop.f32.mrf.mxu2 }
 0x159   : > { %v1693_v27 = vand.u32 2147483647, %v1675_v48  ;;  %v1318_v52 = vadd.f32 %v1266_v49, %v1150_v50  ;;  %v1440_v54 = vpop.f32.mrf.mxu3 }
 0x15a   : > { %v1101_v53 = vpop.f32.mrf.mxu1 }
 0x15b   : > { %v1711_v33 = vadd.f32 1.0, %v1693_v27  ;;  %v1486_v56 = vadd.f32 %v1434_v32, %v1318_v52  ;;  %v1605_v0 = vpop.f32.mrf.mxu0  ;;  %v1151_v59 = vadd.f32 %v1101_v53, %v2902_v18 }
 0x15d   : > { %2506 = vrcp.f32 %v1711_v33  ;;  %v1654_v58 = vadd.f32 %v1602_v45, %v1486_v56  ;;  %v1740_v18 = vand.u32 2147483648, %v1711_v33  ;;  %v1738_v15 = vand.u32 2147483647, %v1711_v33 }
 0x15e   : > { %vm1734_vm3 = vweird.f32 %v1711_v33 }
 0x15f   : > { %v3072_v60 = vadd.f32 %v3061_v26, %v1654_v58  ;;  %v1741_v35 = vor.u32 1.1754944e-38, %v1740_v18  ;;  %vm1739_vm5 = vcmp.eq.f32.partialorder %v1738_v15, 8.507059e+37 }
 0x160   : > { %v1269_v62 = vpop.f32.mrf.mxu2 }
 0x161   : > { %v1319_v5 = vadd.f32 %v1269_v62, %v1151_v59  ;;  %v1694_v63 = vand.u32 2147483647, %v3072_v60  ;;  %v1443_v2 = vpop.f32.mrf.mxu3 }
 0x162   : > { %v1104_v1 = vpop.f32.mrf.mxu1 }
 0x163   : > { %v2507_v8 = vpop.eup %2506  ;;  %v1487_v4 = vadd.f32 %v1437_v42, %v1319_v5  ;;  %v1608_v6 = vpop.f32.mrf.mxu0  ;;  %v1712_v10 = vadd.f32 1.0, %v1694_v63  ;;  %v1152_v17 = vadd.f32 %v1104_v1, %v2912_v36 }
 0x164   : > { %v1730_v9 = vmul.f32 %v2507_v8, %v1711_v33  ;;  %vm1735_vm2 = vweird.f32 %v2507_v8 }
 0x165   : > { %v1655_v11 = vadd.f32 %v1605_v0, %v1487_v4  ;;  %2508 = vrcp.f32 %v1712_v10  ;;  %vm1736_vm4 = vmor %vm1734_vm3, %vm1735_vm2  ;;  %v1752_v47 = vand.u32 2147483647, %v1712_v10  ;;  %v1754_v50 = vand.u32 2147483648, %v1712_v10 }
 0x166   : > { %v1731_v12 = vsub.f32 1.0, %v1730_v9  ;;  %vm1748_vm8 = vweird.f32 %v1712_v10 }
 0x167   : > { %v3078_v16 = vadd.f32 %v3061_v26, %v1655_v11  ;;  %v1755_v59 = vor.u32 1.1754944e-38, %v1754_v50  ;;  %vm1753_vm10 = vcmp.eq.f32.partialorder %v1752_v47, 8.507059e+37 }
 0x168   : > { %v1732_v21 = vmul.f32 %v2507_v8, %v1731_v12  ;;  %v1272_v25 = vpop.f32.mrf.mxu2 }
 0x169   : > { %v1695_v13 = vand.u32 2147483647, %v3078_v16  ;;  %v1320_v29 = vadd.f32 %v1272_v25, %v1152_v17  ;;  %v1446_v19 = vpop.f32.mrf.mxu3 }
 0x16a   : > { %v1733_v31 = vadd.f32 %v2507_v8, %v1732_v21  ;;  %v1107_v32 = vpop.f32.mrf.mxu1 }
 0x16b   : > { %v1713_v23 = vadd.f32 1.0, %v1695_v13  ;;  %v1488_v22 = vadd.f32 %v1440_v54, %v1320_v29  ;;  %v1611_v36 = vpop.f32.mrf.mxu0  ;;  %v2509_v38 = vpop.eup %2508  ;;  %v1153_v45 = vadd.f32 %v1107_v32, %v2922_v46 }
 0x16c   : > { %v1737_v39 = vsel %vm1736_vm4, %v2507_v8, %v1733_v31  ;;  %v1744_v41 = vmul.f32 %v2509_v38, %v1712_v10  ;;  %vm1749_vm7 = vweird.f32 %v2509_v38 }
 0x16d   : > { %v1742_v20 = vsel %vm1739_vm5, %v1741_v35, %v1737_v39  ;;  %2510 = vrcp.f32 %v1713_v23  ;;  %v1656_v30 = vadd.f32 %v1608_v6, %v1488_v22  ;;  %vm1750_vm9 = vmor %vm1748_vm8, %vm1749_vm7  ;;  %v1768_v9 = vand.u32 2147483648, %v1713_v23 }
 0x16e   : > { %v1981_v42 = vmul.f32 %v1742_v20, %v1675_v48  ;;  %v1745_v43 = vsub.f32 1.0, %v1744_v41  ;;  %vm1762_vm12 = vweird.f32 %v1713_v23 }
 0x16f   : > { %v3090_v52 = vadd.f32 %v3061_v26, %v1656_v30  ;;  %v1769_v13 = vor.u32 1.1754944e-38, %v1768_v9 }
 0x170   : > { %2000 = vst.msk [vmem:[%s3084_s29] sm:$0xff] %vm1999_vm6, %v1981_v42  ;;  %v1275_v49 = vpop.f32.mrf.mxu2  ;;  %v1746_v27 = vmul.f32 %v2509_v38, %v1745_v43 }
 0x171   : > { %v1321_v53 = vadd.f32 %v1275_v49, %v1153_v45  ;;  %v1449_v33 = vpop.f32.mrf.mxu3  ;;  %v1696_v48 = vand.u32 2147483647, %v3090_v52 }
 0x172   : > { %v1110_v54 = vpop.f32.mrf.mxu1  ;;  %v1747_v0 = vadd.f32 %v2509_v38, %v1746_v27 }
 0x173   : > { %v2511_v56 = vpop.eup %2510  ;;  %v1489_v46 = vadd.f32 %v1443_v2, %v1321_v53  ;;  %v1614_v58 = vpop.f32.mrf.mxu0  ;;  %v1714_v63 = vadd.f32 1.0, %v1696_v48  ;;  %v1154_v10 = vadd.f32 %v1110_v54, %v2932_v57  ;;  %v1766_v2 = vand.u32 2147483647, %v1713_v23 }
 0x174   : > { %v1758_v62 = vmul.f32 %v2511_v56, %v1713_v23  ;;  %v1751_v5 = vsel %vm1750_vm9, %v2509_v38, %v1747_v0  ;;  %vm1763_vm11 = vweird.f32 %v2511_v56 }
 0x175   : > { %v1657_v1 = vadd.f32 %v1611_v36, %v1489_v46  ;;  %v1756_v8 = vsel %vm1753_vm10, %v1755_v59, %v1751_v5  ;;  %2512 = vrcp.f32 %v1714_v63  ;;  %vm1764_vm13 = vmor %vm1762_vm12, %vm1763_vm11  ;;  %vm1767_vm14 = vcmp.eq.f32.partialorder %v1766_v2, 8.507059e+37 }
 0x176   : > { %v1759_v4 = vsub.f32 1.0, %v1758_v62  ;;  %v1982_v6 = vmul.f32 %v1756_v8, %v3072_v60  ;;  %v1782_v42 = vand.u32 2147483648, %v1714_v63  ;;  %v1780_v47 = vand.u32 2147483647, %v1714_v63 }
 0x177   : > { %v3096_v12 = vadd.f32 %v3061_v26, %v1657_v1  ;;  %vm1776_vm0 = vweird.f32 %v1714_v63 }
 0x178   : > { %v1760_v11 = vmul.f32 %v2511_v56, %v1759_v4  ;;  %v1278_v18 = vpop.f32.mrf.mxu2  ;;  %2001 = vst.msk [vmem:[%s3084_s29 + $0x8] sm:$0xff] %vm1999_vm6, %v1982_v6  ;;  %vm1781_vm2 = vcmp.eq.f32.partialorder %v1780_v47, 8.507059e+37 }
 0x179   : > { %v1322_v17 = vadd.f32 %v1278_v18, %v1154_v10  ;;  %v1697_v15 = vand.u32 2147483647, %v3096_v12  ;;  %v1452_v60 = vpop.f32.mrf.mxu3 }
 0x17a   : > { %v1761_v21 = vadd.f32 %v2511_v56, %v1760_v11  ;;  %v1113_v25 = vpop.f32.mrf.mxu1 }
 0x17b   : > { %v1490_v57 = vadd.f32 %v1446_v19, %v1322_v17  ;;  %v1617_v29 = vpop.f32.mrf.mxu0  ;;  %v1715_v32 = vadd.f32 1.0, %v1697_v15  ;;  %v2513_v35 = vpop.eup %2512  ;;  %v1155_v23 = vadd.f32 %v1113_v25, %v2942_v7 }
 0x17c   : > { %v1765_v31 = vsel %vm1764_vm13, %v2511_v56, %v1761_v21  ;;  %v1772_v39 = vmul.f32 %v2513_v35, %v1714_v63  ;;  %vm1777_vm15 = vweird.f32 %v2513_v35  ;;  %v1783_v56 = vor.u32 1.1754944e-38, %v1782_v42 }
 0x17d   : > { %v1770_v22 = vsel %vm1767_vm14, %v1769_v13, %v1765_v31  ;;  %v1658_v36 = vadd.f32 %v1614_v58, %v1490_v57  ;;  %2514 = vrcp.f32 %v1715_v32  ;;  %vm1778_vm1 = vmor %vm1776_vm0, %vm1777_vm15  ;;  %v1794_v4 = vand.u32 2147483647, %v1715_v32 }
 0x17e   : > { %v1983_v38 = vmul.f32 %v1770_v22, %v3078_v16  ;;  %v1773_v41 = vsub.f32 1.0, %v1772_v39  ;;  %vm1790_vm4 = vweird.f32 %v1715_v32 }
 0x17f   : > { %v3104_v20 = vadd.f32 %v3061_v26, %v1658_v36  ;;  %vm1795_vm7 = vcmp.eq.f32.partialorder %v1794_v4, 8.507059e+37 }
 0x180   : > { %2002 = vst.msk [vmem:[%s3084_s29 + $0x10] sm:$0xff] %vm1999_vm6, %v1983_v38  ;;  %v1281_v19 = vpop.f32.mrf.mxu2  ;;  %v1774_v30 = vmul.f32 %v2513_v35, %v1773_v41 }
 0x181   : > { %v1698_v43 = vand.u32 2147483647, %v3104_v20  ;;  %v1323_v45 = vadd.f32 %v1281_v19, %v1155_v23  ;;  %v1455_v16 = vpop.f32.mrf.mxu3 }
 0x182   : > { %v1116_v50 = vpop.f32.mrf.mxu1  ;;  %v1775_v54 = vadd.f32 %v2513_v35, %v1774_v30 }
 0x183   : > { %v3109_v49 = vadd.f32 1.0, %v1698_v43  ;;  %v1491_v27 = vadd.f32 %v1449_v33, %v1323_v45  ;;  %v1620_v7 = vpop.f32.mrf.mxu0  ;;  %v2515_v53 = vpop.eup %2514  ;;  %v1156_v62 = vadd.f32 %v1116_v50, %v2952_v28  ;;  %v1796_v33 = vand.u32 2147483648, %v1715_v32 }
 0x184   : > { %v1786_v0 = vmul.f32 %v2515_v53, %v1715_v32  ;;  %v1779_v48 = vsel %vm1778_vm1, %v2513_v35, %v1775_v54  ;;  %vm1791_vm3 = vweird.f32 %v2515_v53 }
 0x185   : > { %2516 = vrcp.f32 %v3109_v49  ;;  %v1659_v46 = vadd.f32 %v1617_v29, %v1491_v27  ;;  %v1784_v58 = vsel %vm1781_vm2, %v1783_v56, %v1779_v48  ;;  %vm1792_vm5 = vmor %vm1790_vm4, %vm1791_vm3  ;;  %v1797_v17 = vor.u32 1.1754944e-38, %v1796_v33 }
 0x186   : > { %v1787_v59 = vsub.f32 1.0, %v1786_v0  ;;  %v1984_v5 = vmul.f32 %v1784_v58, %v3090_v52  ;;  %v1810_v35 = vand.u32 2147483648, %v3109_v49  ;;  %v1808_v36 = vand.u32 2147483647, %v3109_v49 }
 0x187   : > { %v3115_v1 = vadd.f32 %v3061_v26, %v1659_v46  ;;  %vm1804_vm9 = vweird.f32 %v3109_v49 }
 0x188   : > { %v1284_v63 = vpop.f32.mrf.mxu2  ;;  %v1788_v8 = vmul.f32 %v2515_v53, %v1787_v59  ;;  %2003 = vst.msk [vmem:[%s3084_s29 + $0x18] sm:$0xff] %vm1999_vm6, %v1984_v5  ;;  %vm1809_vm11 = vcmp.eq.f32.partialorder %v1808_v36, 8.507059e+37 }
 0x189   : > { %v1324_v6 = vadd.f32 %v1284_v63, %v1156_v62  ;;  %v1699_v9 = vand.u32 2147483647, %v3115_v1  ;;  %v1458_v11 = vpop.f32.mrf.mxu3 }
 0x18a   : > { %v1119_v10 = vpop.f32.mrf.mxu1  ;;  %v1789_v18 = vadd.f32 %v2515_v53, %v1788_v8 }
 0x18b   : > { %v2517_v2 = vpop.eup %2516  ;;  %v1492_v28 = vadd.f32 %v1452_v60, %v1324_v6  ;;  %v1623_v52 = vpop.f32.mrf.mxu0  ;;  %v1717_v15 = vadd.f32 1.0, %v1699_v9  ;;  %v1157_v32 = vadd.f32 %v1119_v10, %v2962_v40  ;;  %v1811_v40 = vor.u32 1.1754944e-38, %v1810_v35 }
 0x18c   : > { %v1800_v21 = vmul.f32 %v2517_v2, %v3109_v49  ;;  %v1793_v25 = vsel %vm1792_vm5, %v2515_v53, %v1789_v18  ;;  %vm1805_vm8 = vweird.f32 %v2517_v2 }
 0x18d   : > { %v1660_v13 = vadd.f32 %v1620_v7, %v1492_v28  ;;  %v1798_v57 = vsel %vm1795_vm7, %v1797_v17, %v1793_v25  ;;  %2518 = vrcp.f32 %v1717_v15  ;;  %vm1806_vm10 = vmor %vm1804_vm9, %vm1805_vm8  ;;  %v1822_v56 = vand.u32 2147483647, %v1717_v15 }
 0x18e   : > { %v1801_v29 = vsub.f32 1.0, %v1800_v21  ;;  %v1985_v31 = vmul.f32 %v1798_v57, %v3096_v12  ;;  %v1824_v0 = vand.u32 2147483648, %v1717_v15  ;;  %vm1818_vm13 = vweird.f32 %v1717_v15 }
 0x18f   : > { %v3125_v60 = vadd.f32 %v3061_v26, %v1660_v13  ;;  %vm1823_vm15 = vcmp.eq.f32.partialorder %v1822_v56, 8.507059e+37 }
 0x190   : > { %v1802_v22 = vmul.f32 %v2517_v2, %v1801_v29  ;;  %v1287_v38 = vpop.f32.mrf.mxu2  ;;  %2004 = vst.msk [vmem:[%s3084_s29 + $0x20] sm:$0xff] %vm1999_vm6, %v1985_v31  ;;  %v1825_v63 = vor.u32 1.1754944e-38, %v1824_v0 }
 0x191   : > { %v1700_v39 = vand.u32 2147483647, %v3125_v60  ;;  %v1325_v23 = vadd.f32 %v1287_v38, %v1157_v32  ;;  %v1461_v19 = vpop.f32.mrf.mxu3 }
 0x192   : > { %v1803_v41 = vadd.f32 %v2517_v2, %v1802_v22  ;;  %v1122_v12 = vpop.f32.mrf.mxu1 }
 0x193   : > { %v1718_v42 = vadd.f32 1.0, %v1700_v39  ;;  %v1493_v43 = vadd.f32 %v1455_v16, %v1325_v23  ;;  %v1626_v45 = vpop.f32.mrf.mxu0  ;;  %v2519_v30 = vpop.eup %2518  ;;  %v1158_v54 = vadd.f32 %v1122_v12, %v2972_v51 }
 0x194   : > { %v1807_v47 = vsel %vm1806_vm10, %v2517_v2, %v1803_v41  ;;  %v1814_v27 = vmul.f32 %v2519_v30, %v1717_v15  ;;  %vm1819_vm12 = vweird.f32 %v2519_v30 }
 0x195   : > { %v1812_v50 = vsel %vm1809_vm11, %v1811_v40, %v1807_v47  ;;  %2520 = vrcp.f32 %v1718_v42  ;;  %v1661_v49 = vadd.f32 %v1623_v52, %v1493_v43  ;;  %vm1820_vm14 = vmor %vm1818_vm13, %vm1819_vm12  ;;  %v1838_v52 = vand.u32 2147483648, %v1718_v42 }
 0x196   : > { %v1986_v7 = vmul.f32 %v1812_v50, %v3104_v20  ;;  %v1815_v53 = vsub.f32 1.0, %v1814_v27  ;;  %vm1832_vm1 = vweird.f32 %v1718_v42 }
 0x197   : > { %v3137_v16 = vadd.f32 %v3061_v26, %v1661_v49 }
 0x198   : > { %2005 = vst.msk [vmem:[%s3084_s29 + $0x28] sm:$0xff] %vm1999_vm6, %v1986_v7  ;;  %v1290_v48 = vpop.f32.mrf.mxu2  ;;  %v1816_v46 = vmul.f32 %v2519_v30, %v1815_v53 }
 0x199   : > { %v1326_v58 = vadd.f32 %v1290_v48, %v1158_v54  ;;  %v1701_v20 = vand.u32 2147483647, %v3137_v16  ;;  %v1464_v4 = vpop.f32.mrf.mxu3 }
 0x19a   : > { %v1125_v59 = vpop.f32.mrf.mxu1  ;;  %v1817_v5 = vadd.f32 %v2519_v30, %v1816_v46 }
 0x19b   : > { %v2521_v62 = vpop.eup %2520  ;;  %v1494_v33 = vadd.f32 %v1458_v11, %v1326_v58  ;;  %v1629_v51 = vpop.f32.mrf.mxu0  ;;  %v1719_v9 = vadd.f32 1.0, %v1701_v20  ;;  %v1159_v17 = vadd.f32 %v1125_v59, %v2982_v61  ;;  %v1836_v11 = vand.u32 2147483647, %v1718_v42 }
 0x19c   : > { %v1828_v8 = vmul.f32 %v2521_v62, %v1718_v42  ;;  %v1821_v6 = vsel %vm1820_vm14, %v2519_v30, %v1817_v5  ;;  %vm1833_vm0 = vweird.f32 %v2521_v62 }
 0x19d   : > { %v1662_v10 = vadd.f32 %v1626_v45, %v1494_v33  ;;  %v1826_v2 = vsel %vm1823_vm15, %v1825_v63, %v1821_v6  ;;  %2522 = vrcp.f32 %v1719_v9  ;;  %vm1834_vm2 = vmor %vm1832_vm1, %vm1833_vm0  ;;  %vm1837_vm3 = vcmp.eq.f32.partialorder %v1836_v11, 8.507059e+37 }
 0x19e   : > { %v1829_v18 = vsub.f32 1.0, %v1828_v8  ;;  %v1987_v28 = vmul.f32 %v1826_v2, %v3115_v1  ;;  %v1839_v1 = vor.u32 1.1754944e-38, %v1838_v52  ;;  %v1852_v45 = vand.u32 2147483648, %v1719_v9 }
 0x19f   : > { %v3143_v15 = vadd.f32 %v3061_v26, %v1662_v10  ;;  %v1850_v27 = vand.u32 2147483647, %v1719_v9  ;;  %vm1846_vm5 = vweird.f32 %v1719_v9 }
 0x1a0   : > { %v1830_v21 = vmul.f32 %v2521_v62, %v1829_v18  ;;  %v1293_v25 = vpop.f32.mrf.mxu2  ;;  %2006 = vst.msk [vmem:[%s3084_s29 + $0x30] sm:$0xff] %vm1999_vm6, %v1987_v28  ;;  %v1853_v56 = vor.u32 1.1754944e-38, %v1852_v45 }
 0x1a1   : > { %v1327_v13 = vadd.f32 %v1293_v25, %v1159_v17  ;;  %v1702_v29 = vand.u32 2147483647, %v3143_v15  ;;  %v1467_v12 = vpop.f32.mrf.mxu3  ;;  %vm1851_vm8 = vcmp.eq.f32.partialorder %v1850_v27, 8.507059e+37 }
 0x1a2   : > { %v1831_v57 = vadd.f32 %v2521_v62, %v1830_v21  ;;  %v1128_v31 = vpop.f32.mrf.mxu1 }
 0x1a3   : > { %v1495_v35 = vadd.f32 %v1461_v19, %v1327_v13  ;;  %v1632_v61 = vpop.f32.mrf.mxu0  ;;  %v1720_v22 = vadd.f32 1.0, %v1702_v29  ;;  %v2523_v36 = vpop.eup %2522  ;;  %v1160_v40 = vadd.f32 %v1128_v31, %v2992_v14 }
 0x1a4   : > { %v1835_v32 = vsel %vm1834_vm2, %v2521_v62, %v1831_v57  ;;  %v1842_v41 = vmul.f32 %v2523_v36, %v1719_v9  ;;  %vm1847_vm4 = vweird.f32 %v2523_v36 }
 0x1a5   : > { %v1840_v38 = vsel %vm1837_vm3, %v1839_v1, %v1835_v32  ;;  %v1663_v39 = vadd.f32 %v1629_v51, %v1495_v35  ;;  %2524 = vrcp.f32 %v1720_v22  ;;  %vm1848_vm7 = vmor %vm1846_vm5, %vm1847_vm4  ;;  %v1866_v20 = vand.u32 2147483648, %v1720_v22 }
 0x1a6   : > { %v1988_v23 = vmul.f32 %v1840_v38, %v3125_v60  ;;  %v1843_v19 = vsub.f32 1.0, %v1842_v41  ;;  %vm1860_vm10 = vweird.f32 %v1720_v22 }
 0x1a7   : > { %v3151_v42 = vadd.f32 %v3061_v26, %v1663_v39  ;;  %v1867_v28 = vor.u32 1.1754944e-38, %v1866_v20 }
 0x1a8   : > { %2007 = vst.msk [vmem:[%s3084_s29 + $0x38] sm:$0xff] %vm1999_vm6, %v1988_v23  ;;  %v1296_v43 = vpop.f32.mrf.mxu2  ;;  %v1844_v50 = vmul.f32 %v2523_v36, %v1843_v19 }
 0x1a9   : > { %v1703_v30 = vand.u32 2147483647, %v3151_v42  ;;  %v1328_v47 = vadd.f32 %v1296_v43, %v1160_v40  ;;  %v1470_v63 = vpop.f32.mrf.mxu3 }
 0x1aa   : > { %v1131_v60 = vpop.f32.mrf.mxu1  ;;  %v1845_v49 = vadd.f32 %v2523_v36, %v1844_v50 }
 0x1ab   : > { %v3156_v7 = vadd.f32 1.0, %v1703_v30  ;;  %v1496_v53 = vadd.f32 %v1464_v4, %v1328_v47  ;;  %v1635_v54 = vpop.f32.mrf.mxu0  ;;  %v2525_v14 = vpop.eup %2524  ;;  %v1161_v62 = vadd.f32 %v1131_v60, %v3002_v34  ;;  %v1864_v4 = vand.u32 2147483647, %v1720_v22 }
 0x1ac   : > { %v1856_v0 = vmul.f32 %v2525_v14, %v1720_v22  ;;  %v1849_v48 = vsel %vm1848_vm7, %v2523_v36, %v1845_v49  ;;  %vm1861_vm9 = vweird.f32 %v2525_v14 }
 0x1ad   : > { %2526 = vrcp.f32 %v3156_v7  ;;  %v1664_v46 = vadd.f32 %v1632_v61, %v1496_v53  ;;  %v1854_v58 = vsel %vm1851_vm8, %v1853_v56, %v1849_v48  ;;  %vm1862_vm11 = vmor %vm1860_vm10, %vm1861_vm9  ;;  %vm1865_vm12 = vcmp.eq.f32.partialorder %v1864_v4, 8.507059e+37 }
 0x1ae   : > { %v1857_v59 = vsub.f32 1.0, %v1856_v0  ;;  %v1989_v5 = vmul.f32 %v1854_v58, %v3137_v16  ;;  %v1880_v29 = vand.u32 2147483648, %v3156_v7  ;;  %v1878_v61 = vand.u32 2147483647, %v3156_v7 }
 0x1af   : > { %v3162_v33 = vadd.f32 %v3061_v26, %v1664_v46  ;;  %vm1874_vm14 = vweird.f32 %v3156_v7 }
 0x1b0   : > { %v1299_v51 = vpop.f32.mrf.mxu2  ;;  %v1858_v8 = vmul.f32 %v2525_v14, %v1857_v59  ;;  %2008 = vst.msk [vmem:[%s3084_s29 + $0x40] sm:$0xff] %vm1999_vm6, %v1989_v5  ;;  %vm1879_vm0 = vcmp.eq.f32.partialorder %v1878_v61, 8.507059e+37 }
 0x1b1   : > { %v1329_v6 = vadd.f32 %v1299_v51, %v1161_v62  ;;  %v1704_v9 = vand.u32 2147483647, %v3162_v33  ;;  %v1473_v39 = vpop.f32.mrf.mxu3 }
 0x1b2   : > { %v1134_v10 = vpop.f32.mrf.mxu1  ;;  %v1859_v18 = vadd.f32 %v2525_v14, %v1858_v8 }
 0x1b3   : > { %v2527_v2 = vpop.eup %2526  ;;  %v1497_v34 = vadd.f32 %v1467_v12, %v1329_v6  ;;  %v1638_v16 = vpop.f32.mrf.mxu0  ;;  %v1722_v17 = vadd.f32 1.0, %v1704_v9  ;;  %v1162_v31 = vadd.f32 %v1134_v10, %v3012_v44  ;;  %v1881_v44 = vor.u32 1.1754944e-38, %v1880_v29 }
 0x1b4   : > { %v1870_v52 = vmul.f32 %v2527_v2, %v3156_v7  ;;  %v1863_v21 = vsel %vm1862_vm11, %v2525_v14, %v1859_v18  ;;  %vm1875_vm13 = vweird.f32 %v2527_v2 }
 0x1b5   : > { %v1665_v11 = vadd.f32 %v1635_v54, %v1497_v34  ;;  %v1868_v25 = vsel %vm1865_vm12, %v1867_v28, %v1863_v21  ;;  %2528 = vrcp.f32 %v1722_v17  ;;  %vm1876_vm15 = vmor %vm1874_vm14, %vm1875_vm13  ;;  %v1892_v60 = vand.u32 2147483647, %v1722_v17 }
 0x1b6   : > { %v1871_v13 = vsub.f32 1.0, %v1870_v52  ;;  %v1990_v57 = vmul.f32 %v1868_v25, %v3143_v15  ;;  %v1894_v7 = vand.u32 2147483648, %v1722_v17  ;;  %vm1888_vm2 = vweird.f32 %v1722_v17 }
 0x1b7   : > { %v3172_v1 = vadd.f32 %v3061_v26, %v1665_v11  ;;  %vm1893_vm4 = vcmp.eq.f32.partialorder %v1892_v60, 8.507059e+37 }
 0x1b8   : > { %v1872_v35 = vmul.f32 %v2527_v2, %v1871_v13  ;;  %v1302_v32 = vpop.f32.mrf.mxu2  ;;  %2009 = vst.msk [vmem:[%s3084_s29 + $0x48] sm:$0xff] %vm1999_vm6, %v1990_v57 }
 0x1b9   : > { %v1705_v22 = vand.u32 2147483647, %v3172_v1  ;;  %v1330_v36 = vadd.f32 %v1302_v32, %v1162_v31  ;;  %v1476_v59 = vpop.f32.mrf.mxu3 }
 0x1ba   : > { %v1873_v38 = vadd.f32 %v2527_v2, %v1872_v35  ;;  %v1137_v15 = vpop.f32.mrf.mxu1 }
 0x1bb   : > { %v1723_v23 = vadd.f32 1.0, %v1705_v22  ;;  %v1498_v41 = vadd.f32 %v1470_v63, %v1330_v36  ;;  %v2529_v12 = vpop.eup %2528  ;;  %v1641_v19 = vpop.f32.mrf.mxu0  ;;  %v1163_v50 = vadd.f32 %v1137_v15, %v3022_v55  ;;  %v1895_v55 = vor.u32 1.1754944e-38, %v1894_v7 }
 0x1bc   : > { %v1877_v40 = vsel %vm1876_vm15, %v2527_v2, %v1873_v38  ;;  %v1884_v45 = vmul.f32 %v2529_v12, %v1722_v17  ;;  %vm1889_vm1 = vweird.f32 %v2529_v12 }
 0x1bd   : > { %v1882_v43 = vsel %vm1879_vm0, %v1881_v44, %v1877_v40  ;;  %2530 = vrcp.f32 %v1723_v23  ;;  %v1666_v27 = vadd.f32 %v1638_v16, %v1498_v41  ;;  %vm1890_vm3 = vmor %vm1888_vm2, %vm1889_vm1  ;;  %v1908_v6 = vand.u32 2147483648, %v1723_v23 }
 0x1be   : > { %v1991_v30 = vmul.f32 %v1882_v43, %v3151_v42  ;;  %v1885_v47 = vsub.f32 1.0, %v1884_v45  ;;  %v1906_v2 = vand.u32 2147483647, %v1723_v23  ;;  %vm1902_vm7 = vweird.f32 %v1723_v23 }
 0x1bf   : > { %v3184_v14 = vadd.f32 %v3061_v26, %v1666_v27 }
 0x1c0   : > { %2010 = vst.msk [vmem:[%s3084_s29 + $0x50] sm:$0xff] %vm1999_vm6, %v1991_v30  ;;  %v1305_v53 = vpop.f32.mrf.mxu2  ;;  %v1886_v54 = vmul.f32 %v2529_v12, %v1885_v47  ;;  %vm1907_vm9 = vcmp.eq.f32.partialorder %v1906_v2, 8.507059e+37 }
 0x1c1   : > { %v1331_v49 = vadd.f32 %v1305_v53, %v1163_v50  ;;  %v1706_v42 = vand.u32 2147483647, %v3184_v14  ;;  %v1479_v35 = vpop.f32.mrf.mxu3 }
 0x1c2   : > { %v1140_v56 = vpop.f32.mrf.mxu1  ;;  %v1887_v48 = vadd.f32 %v2529_v12, %v1886_v54 }
 0x1c3   : > { %v2531_v0 = vpop.eup %2530  ;;  %v1499_v46 = vadd.f32 %v1473_v39, %v1331_v49  ;;  %v1724_v5 = vadd.f32 1.0, %v1706_v42  ;;  %v1644_v8 = vpop.f32.mrf.mxu0  ;;  %v1164_v9 = vadd.f32 %v1140_v56, %v3032_v3 }
 0x1c4   : > { %v1898_v58 = vmul.f32 %v2531_v0, %v1723_v23  ;;  %v1891_v62 = vsel %vm1890_vm3, %v2529_v12, %v1887_v48  ;;  %vm1903_vm5 = vweird.f32 %v2531_v0 }
 0x1c5   : > { %v1667_v20 = vadd.f32 %v1641_v19, %v1499_v46  ;;  %v1896_v51 = vsel %vm1893_vm4, %v1895_v55, %v1891_v62  ;;  %2532 = vrcp.f32 %v1724_v5  ;;  %vm1904_vm8 = vmor %vm1902_vm7, %vm1903_vm5  ;;  %v1922_v15 = vand.u32 2147483648, %v1724_v5 }
 0x1c6   : > { %v1899_v63 = vsub.f32 1.0, %v1898_v58  ;;  %v1992_v4 = vmul.f32 %v1896_v51, %v3162_v33  ;;  %v1909_v33 = vor.u32 1.1754944e-38, %v1908_v6  ;;  %vm1916_vm11 = vweird.f32 %v1724_v5 }
 0x1c7   : > { %v3190_v18 = vadd.f32 %v3061_v26, %v1667_v20  ;;  %v1923_v43 = vor.u32 1.1754944e-38, %v1922_v15 }
 0x1c8   : > { %v1900_v10 = vmul.f32 %v2531_v0, %v1899_v63  ;;  %v1308_v34 = vpop.f32.mrf.mxu2  ;;  %2011 = vst.msk [vmem:[%s3084_s29 + $0x58] sm:$0xff] %vm1999_vm6, %v1992_v4 }
 0x1c9   : > { %v1332_v16 = vadd.f32 %v1308_v34, %v1164_v9  ;;  %v1707_v52 = vand.u32 2147483647, %v3190_v18  ;;  %v1482_v56 = vpop.f32.mrf.mxu3 }
 0x1ca   : > { %v1901_v28 = vadd.f32 %v2531_v0, %v1900_v10  ;;  %v1143_v17 = vpop.f32.mrf.mxu1 }
 0x1cb   : > { %v1500_v21 = vadd.f32 %v1476_v59, %v1332_v16  ;;  %v1725_v11 = vadd.f32 1.0, %v1707_v52  ;;  %v2533_v25 = vpop.eup %2532  ;;  %v1165_v61 = vadd.f32 %v1143_v17, %v3042_v24  ;;  %v1647_v38 = vpop.f32.mrf.mxu0 }
 0x1cc   : > { %v1905_v3 = vsel %vm1904_vm8, %v2531_v0, %v1901_v28  ;;  %v1912_v31 = vmul.f32 %v2533_v25, %v1724_v5  ;;  %vm1917_vm10 = vweird.f32 %v2533_v25 }
 0x1cd   : > { %v1910_v13 = vsel %vm1907_vm9, %v1909_v33, %v1905_v3  ;;  %v1668_v57 = vadd.f32 %v1644_v8, %v1500_v21  ;;  %2534 = vrcp.f32 %v1725_v11  ;;  %vm1918_vm12 = vmor %vm1916_vm11, %vm1917_vm10  ;;  %v1936_v53 = vand.u32 2147483648, %v1725_v11 }
 0x1ce   : > { %v1993_v29 = vmul.f32 %v1910_v13, %v3172_v1  ;;  %v1913_v22 = vsub.f32 1.0, %v1912_v31  ;;  %v1920_v1 = vand.u32 2147483647, %v1724_v5  ;;  %v1934_v48 = vand.u32 2147483647, %v1725_v11 }
 0x1cf   : > { %v3198_v32 = vadd.f32 %v3061_v26, %v1668_v57  ;;  %vm1930_vm15 = vweird.f32 %v1725_v11 }
 0x1d0   : > { %2012 = vst.msk [vmem:[%s3084_s29 + $0x60] sm:$0xff] %vm1999_vm6, %v1993_v29  ;;  %v1311_v36 = vpop.f32.mrf.mxu2  ;;  %v1914_v23 = vmul.f32 %v2533_v25, %v1913_v22  ;;  %vm1921_vm13 = vcmp.eq.f32.partialorder %v1920_v1, 8.507059e+37  ;;  %vm1935_vm1 = vcmp.eq.f32.partialorder %v1934_v48, 8.507059e+37 }
 0x1d1   : > { %v1708_v39 = vand.u32 2147483647, %v3198_v32  ;;  %v1333_v44 = vadd.f32 %v1311_v36, %v1165_v61 }
 0x1d2   : > { %v1915_v19 = vadd.f32 %v2533_v25, %v1914_v23  ;;  %v1146_v24 = vpop.f32.mrf.mxu1 }
 0x1d3   : > { %v1726_v41 = vadd.f32 1.0, %v1708_v39  ;;  %v1501_v12 = vadd.f32 %v1479_v35, %v1333_v44  ;;  %v2535_v40 = vpop.eup %2534  ;;  %v1166_v60 = vadd.f32 %v1146_v24, %v3051_v37  ;;  %v1650_v55 = vpop.f32.mrf.mxu0  ;;  %v1937_v37 = vor.u32 1.1754944e-38, %v1936_v53 }
 0x1d4   : > { %v1926_v45 = vmul.f32 %v2535_v40, %v1725_v11  ;;  %v1919_v30 = vsel %vm1918_vm12, %v2533_v25, %v1915_v19  ;;  %vm1931_vm14 = vweird.f32 %v2535_v40 }
 0x1d5   : > { %2536 = vrcp.f32 %v1726_v41  ;;  %v1669_v47 = vadd.f32 %v1647_v38, %v1501_v12  ;;  %v1924_v50 = vsel %vm1921_vm13, %v1923_v43, %v1919_v30  ;;  %vm1932_vm0 = vmor %vm1930_vm15, %vm1931_vm14  ;;  %v1950_v6 = vand.u32 2147483648, %v1726_v41 }
 0x1d6   : > { %v1927_v27 = vsub.f32 1.0, %v1926_v45  ;;  %v1994_v7 = vmul.f32 %v1924_v50, %v3184_v14  ;;  %v1948_v2 = vand.u32 2147483647, %v1726_v41  ;;  %vm1944_vm3 = vweird.f32 %v1726_v41 }
 0x1d7   : > { %v1691_v54 = vadd.f32 %v3061_v26, %v1669_v47  ;;  %v1951_v28 = vor.u32 1.1754944e-38, %v1950_v6 }
 0x1d8   : > { %v1314_v49 = vpop.f32.mrf.mxu2  ;;  %v1928_v0 = vmul.f32 %v2535_v40, %v1927_v27  ;;  %2013 = vst.msk [vmem:[%s3084_s29 + $0x68] sm:$0xff] %vm1999_vm6, %v1994_v7  ;;  %vm1949_vm5 = vcmp.eq.f32.partialorder %v1948_v2, 8.507059e+37 }
 0x1d9   : > { %v1334_v42 = vadd.f32 %v1314_v49, %v1166_v60  ;;  %v1709_v46 = vand.u32 2147483647, %v1691_v54 }
 0x1da   : > { %v1929_v59 = vadd.f32 %v2535_v40, %v1928_v0 }
 0x1db   : > { %v2537_v58 = vpop.eup %2536  ;;  %v1502_v62 = vadd.f32 %v1482_v56, %v1334_v42  ;;  %v1727_v5 = vadd.f32 1.0, %v1709_v46 }
 0x1dc   : > { %v1940_v14 = vmul.f32 %v2537_v58, %v1726_v41  ;;  %v1933_v20 = vsel %vm1932_vm0, %v2535_v40, %v1929_v59  ;;  %vm1945_vm2 = vweird.f32 %v2537_v58 }
 0x1dd   : > { %v1670_v51 = vadd.f32 %v1650_v55, %v1502_v62  ;;  %v1938_v63 = vsel %vm1935_vm1, %v1937_v37, %v1933_v20  ;;  %2538 = vrcp.f32 %v1727_v5  ;;  %vm1946_vm4 = vmor %vm1944_vm3, %vm1945_vm2  ;;  %v1964_v11 = vand.u32 2147483648, %v1727_v5 }
 0x1de   : > { %v1941_v8 = vsub.f32 1.0, %v1940_v14  ;;  %v1995_v4 = vmul.f32 %v1938_v63, %v3190_v18  ;;  %v1962_v13 = vand.u32 2147483647, %v1727_v5  ;;  %vm1958_vm8 = vweird.f32 %v1727_v5 }
 0x1df   : > { %v1692_v9 = vadd.f32 %v3061_v26, %v1670_v51  ;;  %v1965_v31 = vor.u32 1.1754944e-38, %v1964_v11 }
 0x1e0   : > { %v1942_v10 = vmul.f32 %v2537_v58, %v1941_v8  ;;  %2014 = vst.msk [vmem:[%s3084_s29 + $0x70] sm:$0xff] %vm1999_vm6, %v1995_v4  ;;  %vm1963_vm10 = vcmp.eq.f32.partialorder %v1962_v13, 8.507059e+37 }
 0x1e1   : > { %v1710_v34 = vand.u32 2147483647, %v1692_v9 }
 0x1e2   : > { %v1943_v16 = vadd.f32 %v2537_v58, %v1942_v10 }
 0x1e3   : > { %v1728_v52 = vadd.f32 1.0, %v1710_v34  ;;  %v2539_v17 = vpop.eup %2538 }
 0x1e4   : > { %v1947_v33 = vsel %vm1946_vm4, %v2537_v58, %v1943_v16  ;;  %v1954_v18 = vmul.f32 %v2539_v17, %v1727_v5  ;;  %vm1959_vm7 = vweird.f32 %v2539_v17 }
 0x1e5   : > { %v1952_v21 = vsel %vm1949_vm5, %v1951_v28, %v1947_v33  ;;  %2540 = vrcp.f32 %v1728_v52  ;;  %vm1960_vm9 = vmor %vm1958_vm8, %vm1959_vm7  ;;  %v1978_v38 = vand.u32 2147483648, %v1728_v52  ;;  %v1976_v39 = vand.u32 2147483647, %v1728_v52 }
 0x1e6   : > { %v1996_v26 = vmul.f32 %v1952_v21, %v3198_v32  ;;  %v1955_v3 = vsub.f32 1.0, %v1954_v18  ;;  %vm1972_vm12 = vweird.f32 %v1728_v52 }
 0x1e7   : > { %v1979_v23 = vor.u32 1.1754944e-38, %v1978_v38  ;;  %vm1977_vm14 = vcmp.eq.f32.partialorder %v1976_v39, 8.507059e+37 }
 0x1e8   : > { %2015 = vst.msk [vmem:[%s3084_s29 + $0x78] sm:$0xff] %vm1999_vm6, %v1996_v26  ;;  %v1956_v25 = vmul.f32 %v2539_v17, %v1955_v3 }
 0x1ea   : > { %v1957_v29 = vadd.f32 %v2539_v17, %v1956_v25 }
 0x1eb   : > { %v2541_v57 = vpop.eup %2540 }
 0x1ec   : > { %v1968_v35 = vmul.f32 %v2541_v57, %v1728_v52  ;;  %v1961_v61 = vsel %vm1960_vm9, %v2539_v17, %v1957_v29  ;;  %vm1973_vm11 = vweird.f32 %v2541_v57 }
 0x1ed   : > { %v1966_v22 = vsel %vm1963_vm10, %v1965_v31, %v1961_v61  ;;  %vm1974_vm13 = vmor %vm1972_vm12, %vm1973_vm11 }
 0x1ee   : > { %v1969_v36 = vsub.f32 1.0, %v1968_v35  ;;  %v1997_v32 = vmul.f32 %v1966_v22, %v1691_v54 }
 0x1f0   : > { %v1970_v15 = vmul.f32 %v2541_v57, %v1969_v36  ;;  %2016 = vst.msk [vmem:[%s3084_s29 + $0x80] sm:$0xff] %vm1999_vm6, %v1997_v32 }
 0x1f2   : > { %v1971_v44 = vadd.f32 %v2541_v57, %v1970_v15 }
 0x1f4   : > { %v1975_v1 = vsel %vm1974_vm13, %v2541_v57, %v1971_v44 }
 0x1f5   : > { %v1980_v41 = vsel %vm1977_vm14, %v1979_v23, %v1975_v1 }
 0x1f6   : > { %v1998_v12 = vmul.f32 %v1980_v41, %v1692_v9 }
 0x1f8   : > { %2017 = vst.msk [vmem:[%s3084_s29 + $0x88] sm:$0xff] %vm1999_vm6, %v1998_v12 }
 0x1f9 PF: > { %s13_s16 = sadd.s32 1, %s2580_s16   ;;  %s3238_s12 = smov %s2572_s14 }
 0x1fa   : > { %p10_p7 = scmp.ge.s32.totalorder %s13_s16, 6   ;;  %s3239_s13 = smov %s2576_s15 }
 0x1fb   : > { %s3240_s14 = smov %s3243_s17  ;;  %s3241_s15 = smov %s3247_s18 }
 0x1fc   :  { %12 = sbr.rel (!%p10_p7) target bundleno = 3 (0x3), region = 79 }

</bundles_post_ra>
